<compile_context>
chip_gen: v7x
topology: tpu7x:2x2x1
jax: 0.10.0
libtpu: 0.0.40
codegen_flags: <defaults>
</compile_context>

<pallas_src>
import functools
import math

import jax
import jax.numpy as jnp
from jax.experimental import pallas as pl
from jax.experimental.pallas import tpu as pltpu


# ----------------------------- Pallas kernel --------------------------------

def _ocr_kernel(x_ref, k_ref, v_ref, mask_ref,
                wxf, bq1, wq2, bq2, wu, bu, woc, bo,
                out_ref, *, kp, apply_mask):
    f32, bf16 = jnp.float32, jnp.bfloat16

    x = x_ref[0]          # (TQ, Cp)  bf16
    k = k_ref[0]          # (Mp, Kp)  bf16  (precomputed f_object output)
    v = v_ref[0]          # (Mp, Kp)  bf16  (precomputed f_down output)

    def mm(a, w_ref):     # bf16 x bf16 -> f32 accumulation on the MXU
        return jnp.dot(a, w_ref[...], preferred_element_type=f32)

    def relu_bf16(t):     # activation in f32, cast back to bf16 for the next matmul
        return jnp.maximum(t, 0.0).astype(bf16)

    # Shared-LHS fusion: one pass over x produces both the f_pixel hidden layer and the
    # feats-half of the fuse conv (slice at the lane-aligned kp boundary).
    xw = mm(x, wxf)                                   # (TQ, Kp + Op)  f32
    h1 = relu_bf16(xw[:, :kp] + bq1[...])             # (TQ, Kp)
    xo = xw[:, kp:]                                   # (TQ, Op)  f32  == feats @ wof

    # f_pixel second conv+BN+ReLU -> query; 1/sqrt(Kc) is pre-folded into wq2/bq2.
    q = relu_bf16(mm(h1, wq2) + bq2[...])             # (TQ, Kp)

    # sim = q @ k.T without materializing the transpose (contract last dims).
    sim = jax.lax.dot_general(q, k,
                              dimension_numbers=(((1,), (1,)), ((), ())),
                              preferred_element_type=f32)   # (TQ, Mp)
    if apply_mask:
        # additive -1e30 on padded proxy columns, applied BEFORE the max-subtraction
        sim = sim + mask_ref[...]

    sim = sim - jnp.max(sim, axis=-1, keepdims=True)          # stable softmax (f32)
    e = jnp.exp(sim)
    denom = jnp.sum(e, axis=-1, keepdims=True)
    attn = (e * pl.reciprocal(denom, approx=True)).astype(bf16)

    ctx = jnp.dot(attn, v, preferred_element_type=f32).astype(bf16)   # (TQ, Kp)

    # f_up: 1x1 conv + BN + ReLU -> (TQ, Cp)
    up = relu_bf16(mm(ctx, wu) + bu[...])

    # fuse conv over concat([context, feats]): context-half here, feats-half is xo.
    out = jnp.maximum(mm(up, woc) + xo + bo[...], 0.0)                # (TQ, Op)
    out_ref[0] = out.astype(out_ref.dtype)


# ------------------------------ JAX wrapper ----------------------------------

def _ceil_to(x, m):
    return ((x + m - 1) // m) * m


def _pad_to(a, shape):
    pads = [(0, s - d) for d, s in zip(a.shape, shape)]
    if not any(p[1] for p in pads):
        return a
    return jnp.pad(a, pads)


def _default_tq_max():
    # v5e's slower MXU (~197 TF/s) already hides the ~0.35us per-grid-step overhead at
    # TQ=512; v6e/v7x benefit from larger tiles (the VMEM model below caps TQ for v7x).
    try:
        kind = jax.devices()[0].device_kind.lower()
        if "v5e" in kind or "v5 lite" in kind or "v5lite" in kind:
            return 512
    except Exception:
        pass
    return 1024


def spatial_ocr_forward(feats, proxy, params, *, tq_max=None):
    """feats: (N, C, H, W), proxy: (N, C, Hp, Wp)  ->  (N, Cout, H, W)."""
    (wq1, bq1, wq2, bq2, wk1, bk1, wk2, bk2, wv, bv, wu, bu, wo, bo) = params
    N, C, H, W = feats.shape
    _, _, Hp, Wp = proxy.shape
    HW, M = H * W, Hp * Wp
    Kc = wq1.shape[1]
    Cout = wo.shape[1]
    if tq_max is None:
        tq_max = _default_tq_max()

    # -------- host-side parameter transforms (once, cheap) --------
    scale = float(Kc) ** -0.5
    wq2s, bq2s = wq2 * scale, bq2 * scale     # fold attn scale (ReLU commutes with s>0)
    woc, wof = wo[:C], wo[C:]                 # concat([context, feats]) weight split

    LANE, SUB = 128, 16                       # lane width / bf16 sublane packing
    Cp = _ceil_to(C, LANE)
    Kp = _ceil_to(Kc, LANE)
    Op = _ceil_to(Cout, LANE)
    Mp = max(SUB, _ceil_to(M, SUB))           # tiny proxy dim: sublane pad only, not lane

    def _padw(w, r, c):   # weights -> bf16, zero-padded
        return _pad_to(w, (r, c)).astype(jnp.bfloat16)

    def _padb(b, c):      # biases  -> f32, zero-padded
        return _pad_to(b, (1, c)).astype(jnp.float32)

    # shared-LHS fusion: x @ [wq1 | wof]  (slice boundary at Kp is lane-aligned)
    wxf = jnp.concatenate([_padw(wq1, Cp, Kp), _padw(wof, Cp, Op)], axis=1)

    kparams = (
        wxf, _padb(bq1, Kp),
        _padw(wq2s, Kp, Kp), _padb(bq2s, Kp),
        _padw(wu, Kp, Cp), _padb(bu, Cp),
        _padw(woc, Cp, Op), _padb(bo, Op),
    )
    weight_bytes = sum(int(w.size) * w.dtype.itemsize for w in kparams)

    # -------- k/v hoisted out of the per-tile kernel (proxy is tiny, exact f32) --------
    relu = lambda t: jnp.maximum(t, 0.0)
    p_tok = proxy.transpose(0, 2, 3, 1).reshape(N, M, C)               # (N, M, C) f32
    kmat = relu(relu(p_tok @ wk1 + bk1) @ wk2 + bk2)                   # (N, M, Kc)
    vmat = relu(p_tok @ wv + bv)                                       # (N, M, Kc)
    kmat = _pad_to(kmat, (N, Mp, Kp)).astype(jnp.bfloat16)
    vmat = _pad_to(vmat, (N, Mp, Kp)).astype(jnp.bfloat16)

    # additive mask row for padded proxy columns (0 valid / -1e30 pad)
    mask = jnp.where(jnp.arange(Mp)[None, :] < M, 0.0, -1e30).astype(jnp.float32)

    # -------- TQ selection: amortize per-step overhead within a v7x-safe VMEM budget ----
    def _step_vmem(tq):
        io = 2 * tq * (Cp + Op) * 2                    # double-buffered bf16 x / out tiles
        kv = 2 * 2 * Mp * Kp * 2                       # double-buffered bf16 k / v
        tmp = tq * (Kp + Op) * 4 + tq * (Kp + Cp + Op) * 4 + 2 * tq * Mp * 4  # f32 temps
        return io + kv + tmp + 2 * weight_bytes

    VMEM_BUDGET = 28 * 1024 * 1024                     # conservative for v7x (64 MiB VMEM)
    tq = min(tq_max, _ceil_to(HW, SUB))
    tq = _ceil_to(pl.cdiv(HW, pl.cdiv(HW, tq)), SUB)   # minimize HWp padding waste
    while tq > SUB and _step_vmem(tq) > VMEM_BUDGET:
        tq = _ceil_to(tq // 2, SUB)
    TQ = tq
    HWp = _ceil_to(HW, TQ)
    n_tiles = HWp // TQ
    vmem_limit = int(min(max(4 * _step_vmem(TQ), 16 * 1024 * 1024), 32 * 1024 * 1024))

    x = feats.transpose(0, 2, 3, 1).reshape(N, HW, C)
    x = _pad_to(x, (N, HWp, Cp)).astype(jnp.bfloat16)

    # -------- cost estimate (advisory, helps XLA schedule around the kernel) --------
    flops = int(N * 2 * HWp * (Cp * (Kp + Op) + Kp * Kp + 2 * Kp * Mp + Kp * Cp + Cp * Op))
    transcendentals = int(N * HWp * Mp)
    bytes_accessed = int(x.size * 2 + 2 * N * Mp * Kp * 2
                         + weight_bytes + N * HWp * Op * 2)

    in_specs = [
        pl.BlockSpec((1, TQ, Cp), lambda b, t: (b, t, 0)),
        pl.BlockSpec((1, Mp, Kp), lambda b, t: (b, 0, 0)),
        pl.BlockSpec((1, Mp, Kp), lambda b, t: (b, 0, 0)),
        pl.BlockSpec((1, Mp), lambda b, t: (0, 0)),
    ] + [pl.BlockSpec(w.shape, lambda b, t: (0, 0)) for w in kparams]

    out = pl.pallas_call(
        functools.partial(_ocr_kernel, kp=Kp, apply_mask=bool(M < Mp)),
        out_shape=jax.ShapeDtypeStruct((N, HWp, Op), jnp.bfloat16),
        grid_spec=pltpu.PrefetchScalarGridSpec(
            num_scalar_prefetch=0,
            grid=(N, n_tiles),
            in_specs=in_specs,
            out_specs=pl.BlockSpec((1, TQ, Op), lambda b, t: (b, t, 0)),
        ),
        compiler_params=pltpu.CompilerParams(
            dimension_semantics=("parallel", "parallel"),
            vmem_limit_bytes=vmem_limit,
        ),
        cost_estimate=pl.CostEstimate(
            flops=flops, transcendentals=transcendentals,
            bytes_accessed=bytes_accessed),
    )(x, kmat, vmat, mask, *kparams)

    out = out[:, :HW, :Cout].astype(jnp.float32)
    return out.reshape(N, H, W, Cout).transpose(0, 3, 1, 2)


# --------------------------- parameter construction --------------------------

def _fold_bn(w, gamma, beta, mean, var, eps=1e-5):
    """Fold eval-mode BatchNorm into a bias-free 1x1 conv. w: (Cin, Cout)."""
    scale = gamma / jnp.sqrt(var + eps)
    return w * scale[None, :], (beta - mean * scale).reshape(1, -1)


def make_params(key, in_channels, key_channels, out_channels):
    keys = iter(jax.random.split(key, 64))

    def conv_bn(cin, cout):
        w = jax.random.normal(next(keys), (cin, cout), jnp.float32) / math.sqrt(cin)
        gamma = jax.random.uniform(next(keys), (cout,), jnp.float32, 0.5, 1.5)
        beta = jax.random.normal(next(keys), (cout,), jnp.float32) * 0.1
        mean = jax.random.normal(next(keys), (cout,), jnp.float32) * 0.1
        var = jax.random.uniform(next(keys), (cout,), jnp.float32, 0.5, 1.5)
        return _fold_bn(w, gamma, beta, mean, var)

    wq1, bq1 = conv_bn(in_channels, key_channels)
    wq2, bq2 = conv_bn(key_channels, key_channels)
    wk1, bk1 = conv_bn(in_channels, key_channels)
    wk2, bk2 = conv_bn(key_channels, key_channels)
    wv, bv = conv_bn(in_channels, key_channels)
    wu, bu = conv_bn(key_channels, in_channels)
    wo, bo = conv_bn(2 * in_channels, out_channels)   # conv over concat([context, feats])

    return (wq1, bq1, wq2, bq2, wk1, bk1, wk2, bk2, wv, bv, wu, bu, wo, bo)


# ------------------------------ pure-JAX reference ---------------------------

def reference_forward(feats, proxy, params):
    (wq1, bq1, wq2, bq2, wk1, bk1, wk2, bk2, wv, bv, wu, bu, wo, bo) = params
    N, C, H, W = feats.shape
    _, _, Hp, Wp = proxy.shape
    x = feats.transpose(0, 2, 3, 1).reshape(N, H * W, C)
    p = proxy.transpose(0, 2, 3, 1).reshape(N, Hp * Wp, C)
    relu = lambda t: jnp.maximum(t, 0.0)
    q = relu(relu(x @ wq1 + bq1) @ wq2 + bq2)
    k = relu(relu(p @ wk1 + bk1) @ wk2 + bk2)
    v = relu(p @ wv + bv)
    sim = jnp.einsum("nqc,nkc->nqk", q, k) * (q.shape[-1] ** -0.5)
    attn = jax.nn.softmax(sim, axis=-1)
    ctx = jnp.einsum("nqk,nkc->nqc", attn, v)
    up = relu(ctx @ wu + bu)
    out = relu(jnp.concatenate([up, x], axis=-1) @ wo + bo)
    return out.reshape(N, H, W, -1).transpose(0, 3, 1, 2)


# ----------------------------------- main ------------------------------------

if __name__ == "__main__":
    N, C, Kc, Cout = 2, 32, 16, 32
    H = W = 8
    Hp, Wp = 8, 1   # proxy: 8 object-region descriptors per image

    key = jax.random.PRNGKey(0)
    kf, kp, kw = jax.random.split(key, 3)
    feats = jax.random.normal(kf, (N, C, H, W), jnp.float32)
    proxy = jax.random.normal(kp, (N, C, Hp, Wp), jnp.float32)
    params = make_params(kw, C, Kc, Cout)

    out = spatial_ocr_forward(feats, proxy, params)
    jax.block_until_ready(out)

    assert out.shape == (N, Cout, H, W), out.shape
    ref = reference_forward(feats, proxy, params)
    # Tolerance sized for bf16 matmul operands propagating through the attention chain
    # (reference runs entirely in f32).
    assert jnp.allclose(out, ref, rtol=1e-1, atol=1e-1), "mismatch vs reference"

    print("KERNEL_OK")
</pallas_src>

<mosaic_0001>
module attributes {stable_mosaic.version = 11 : i64} {
  func.func @_ocr_kernel(%arg0: i32, %arg1: i32, %arg2: memref<1x64x128xbf16, #tpu.memory_space<vmem>>, %arg3: memref<1x16x128xbf16, #tpu.memory_space<vmem>>, %arg4: memref<1x16x128xbf16, #tpu.memory_space<vmem>>, %arg5: memref<1x16xf32, #tpu.memory_space<vmem>>, %arg6: memref<128x256xbf16, #tpu.memory_space<vmem>>, %arg7: memref<1x128xf32, #tpu.memory_space<vmem>>, %arg8: memref<128x128xbf16, #tpu.memory_space<vmem>>, %arg9: memref<1x128xf32, #tpu.memory_space<vmem>>, %arg10: memref<128x128xbf16, #tpu.memory_space<vmem>>, %arg11: memref<1x128xf32, #tpu.memory_space<vmem>>, %arg12: memref<128x128xbf16, #tpu.memory_space<vmem>>, %arg13: memref<1x128xf32, #tpu.memory_space<vmem>>, %arg14: memref<1x64x128xbf16, #tpu.memory_space<vmem>>) attributes {dimension_semantics = [#tpu.dimension_semantics<parallel>, #tpu.dimension_semantics<parallel>], iteration_bounds = array<i64: 2, 1>, scalar_prefetch = 0 : i64, scratch_operands = 0 : i64, tpu.core_type = #tpu.core_type<tc>, window_params = [{transform_indices = @transform_0, window_bounds = array<i64: 1, 64, 128>}, {transform_indices = @transform_1, window_bounds = array<i64: 1, 16, 128>}, {transform_indices = @transform_2, window_bounds = array<i64: 1, 16, 128>}, {pipeline_mode = #tpu.pipeline_mode<synchronous>, transform_indices = @transform_3, window_bounds = array<i64: 1, 16>}, {pipeline_mode = #tpu.pipeline_mode<synchronous>, transform_indices = @transform_4, window_bounds = array<i64: 128, 256>}, {pipeline_mode = #tpu.pipeline_mode<synchronous>, transform_indices = @transform_5, window_bounds = array<i64: 1, 128>}, {pipeline_mode = #tpu.pipeline_mode<synchronous>, transform_indices = @transform_6, window_bounds = array<i64: 128, 128>}, {pipeline_mode = #tpu.pipeline_mode<synchronous>, transform_indices = @transform_7, window_bounds = array<i64: 1, 128>}, {pipeline_mode = #tpu.pipeline_mode<synchronous>, transform_indices = @transform_8, window_bounds = array<i64: 128, 128>}, {pipeline_mode = #tpu.pipeline_mode<synchronous>, transform_indices = @transform_9, window_bounds = array<i64: 1, 128>}, {pipeline_mode = #tpu.pipeline_mode<synchronous>, transform_indices = @transform_10, window_bounds = array<i64: 128, 128>}, {pipeline_mode = #tpu.pipeline_mode<synchronous>, transform_indices = @transform_11, window_bounds = array<i64: 1, 128>}, {transform_indices = @transform_12, window_bounds = array<i64: 1, 64, 128>}]} {
    %c0 = arith.constant 0 : index
    %c0_0 = arith.constant 0 : index
    %c0_1 = arith.constant 0 : index
    %0 = vector.load %arg2[%c0, %c0_0, %c0_1] : memref<1x64x128xbf16, #tpu.memory_space<vmem>>, vector<1x64x128xbf16>
    %1 = vector.shape_cast %0 : vector<1x64x128xbf16> to vector<64x128xbf16>
    %c0_2 = arith.constant 0 : index
    %c0_3 = arith.constant 0 : index
    %c0_4 = arith.constant 0 : index
    %2 = vector.load %arg3[%c0_2, %c0_3, %c0_4] : memref<1x16x128xbf16, #tpu.memory_space<vmem>>, vector<1x16x128xbf16>
    %3 = vector.shape_cast %2 : vector<1x16x128xbf16> to vector<16x128xbf16>
    %c0_5 = arith.constant 0 : index
    %c0_6 = arith.constant 0 : index
    %c0_7 = arith.constant 0 : index
    %4 = vector.load %arg4[%c0_5, %c0_6, %c0_7] : memref<1x16x128xbf16, #tpu.memory_space<vmem>>, vector<1x16x128xbf16>
    %5 = vector.shape_cast %4 : vector<1x16x128xbf16> to vector<16x128xbf16>
    %c0_8 = arith.constant 0 : index
    %c0_9 = arith.constant 0 : index
    %6 = vector.load %arg6[%c0_8, %c0_9] : memref<128x256xbf16, #tpu.memory_space<vmem>>, vector<128x256xbf16>
    %cst = arith.constant dense<0.000000e+00> : vector<64x256xf32>
    %7 = tpu.matmul %1, %6, %cst {dimension_numbers = #tpu.dot_dimension_numbers<[1], [0], [0], [1], [0, 0, 1, 1], [], []>} : vector<64x128xbf16>, vector<128x256xbf16>, vector<64x256xf32> -> vector<64x256xf32>
    %8 = vector.extract_strided_slice %7 {offsets = [0, 0], sizes = [64, 128], strides = [1, 1]} : vector<64x256xf32> to vector<64x128xf32>
    %c0_10 = arith.constant 0 : index
    %c0_11 = arith.constant 0 : index
    %9 = vector.load %arg7[%c0_10, %c0_11] : memref<1x128xf32, #tpu.memory_space<vmem>>, vector<1x128xf32>
    %10 = vector.broadcast %9 : vector<1x128xf32> to vector<64x128xf32>
    %11 = arith.addf %8, %10 : vector<64x128xf32>
    %cst_12 = arith.constant 0.000000e+00 : f32
    %12 = vector.broadcast %cst_12 : f32 to vector<64x128xf32>
    %13 = arith.maximumf %11, %12 : vector<64x128xf32>
    %14 = arith.truncf %13 : vector<64x128xf32> to vector<64x128xbf16>
    %15 = vector.extract_strided_slice %7 {offsets = [0, 128], sizes = [64, 128], strides = [1, 1]} : vector<64x256xf32> to vector<64x128xf32>
    %c0_13 = arith.constant 0 : index
    %c0_14 = arith.constant 0 : index
    %16 = vector.load %arg8[%c0_13, %c0_14] : memref<128x128xbf16, #tpu.memory_space<vmem>>, vector<128x128xbf16>
    %cst_15 = arith.constant dense<0.000000e+00> : vector<64x128xf32>
    %17 = tpu.matmul %14, %16, %cst_15 {dimension_numbers = #tpu.dot_dimension_numbers<[1], [0], [0], [1], [0, 0, 1, 1], [], []>} : vector<64x128xbf16>, vector<128x128xbf16>, vector<64x128xf32> -> vector<64x128xf32>
    %c0_16 = arith.constant 0 : index
    %c0_17 = arith.constant 0 : index
    %18 = vector.load %arg9[%c0_16, %c0_17] : memref<1x128xf32, #tpu.memory_space<vmem>>, vector<1x128xf32>
    %19 = vector.broadcast %18 : vector<1x128xf32> to vector<64x128xf32>
    %20 = arith.addf %17, %19 : vector<64x128xf32>
    %cst_18 = arith.constant 0.000000e+00 : f32
    %21 = vector.broadcast %cst_18 : f32 to vector<64x128xf32>
    %22 = arith.maximumf %20, %21 : vector<64x128xf32>
    %23 = arith.truncf %22 : vector<64x128xf32> to vector<64x128xbf16>
    %cst_19 = arith.constant dense<0.000000e+00> : vector<64x16xf32>
    %24 = tpu.matmul %23, %3, %cst_19 {dimension_numbers = #tpu.dot_dimension_numbers<[1], [1], [0], [0], [0, 0, 1, 0], [], []>} : vector<64x128xbf16>, vector<16x128xbf16>, vector<64x16xf32> -> vector<64x16xf32>
    %c0_20 = arith.constant 0 : index
    %c0_21 = arith.constant 0 : index
    %25 = vector.load %arg5[%c0_20, %c0_21] : memref<1x16xf32, #tpu.memory_space<vmem>>, vector<1x16xf32>
    %26 = vector.broadcast %25 : vector<1x16xf32> to vector<64x16xf32>
    %27 = arith.addf %24, %26 : vector<64x16xf32>
    %cst_22 = arith.constant dense<0xFF800000> : vector<64xf32>
    %28 = vector.multi_reduction <maximumf>, %27, %cst_22 [1] : vector<64x16xf32> to vector<64xf32>
    %29 = vector.shape_cast %28 : vector<64xf32> to vector<64x1xf32>
    %30 = vector.broadcast %29 : vector<64x1xf32> to vector<64x16xf32>
    %31 = arith.subf %27, %30 : vector<64x16xf32>
    %32 = math.exp %31 : vector<64x16xf32>
    %cst_23 = arith.constant dense<0.000000e+00> : vector<64xf32>
    %33 = vector.multi_reduction <add>, %32, %cst_23 [1] : vector<64x16xf32> to vector<64xf32>
    %34 = vector.shape_cast %33 : vector<64xf32> to vector<64x1xf32>
    %35 = tpu.reciprocal %34 {approx = true} : vector<64x1xf32> -> vector<64x1xf32>
    %36 = vector.broadcast %35 : vector<64x1xf32> to vector<64x16xf32>
    %37 = arith.mulf %32, %36 : vector<64x16xf32>
    %38 = arith.truncf %37 : vector<64x16xf32> to vector<64x16xbf16>
    %cst_24 = arith.constant dense<0.000000e+00> : vector<64x128xf32>
    %39 = tpu.matmul %38, %5, %cst_24 {dimension_numbers = #tpu.dot_dimension_numbers<[1], [0], [0], [1], [0, 0, 1, 1], [], []>} : vector<64x16xbf16>, vector<16x128xbf16>, vector<64x128xf32> -> vector<64x128xf32>
    %40 = arith.truncf %39 : vector<64x128xf32> to vector<64x128xbf16>
    %c0_25 = arith.constant 0 : index
    %c0_26 = arith.constant 0 : index
    %41 = vector.load %arg10[%c0_25, %c0_26] : memref<128x128xbf16, #tpu.memory_space<vmem>>, vector<128x128xbf16>
    %cst_27 = arith.constant dense<0.000000e+00> : vector<64x128xf32>
    %42 = tpu.matmul %40, %41, %cst_27 {dimension_numbers = #tpu.dot_dimension_numbers<[1], [0], [0], [1], [0, 0, 1, 1], [], []>} : vector<64x128xbf16>, vector<128x128xbf16>, vector<64x128xf32> -> vector<64x128xf32>
    %c0_28 = arith.constant 0 : index
    %c0_29 = arith.constant 0 : index
    %43 = vector.load %arg11[%c0_28, %c0_29] : memref<1x128xf32, #tpu.memory_space<vmem>>, vector<1x128xf32>
    %44 = vector.broadcast %43 : vector<1x128xf32> to vector<64x128xf32>
    %45 = arith.addf %42, %44 : vector<64x128xf32>
    %cst_30 = arith.constant 0.000000e+00 : f32
    %46 = vector.broadcast %cst_30 : f32 to vector<64x128xf32>
    %47 = arith.maximumf %45, %46 : vector<64x128xf32>
    %48 = arith.truncf %47 : vector<64x128xf32> to vector<64x128xbf16>
    %c0_31 = arith.constant 0 : index
    %c0_32 = arith.constant 0 : index
    %49 = vector.load %arg12[%c0_31, %c0_32] : memref<128x128xbf16, #tpu.memory_space<vmem>>, vector<128x128xbf16>
    %cst_33 = arith.constant dense<0.000000e+00> : vector<64x128xf32>
    %50 = tpu.matmul %48, %49, %cst_33 {dimension_numbers = #tpu.dot_dimension_numbers<[1], [0], [0], [1], [0, 0, 1, 1], [], []>} : vector<64x128xbf16>, vector<128x128xbf16>, vector<64x128xf32> -> vector<64x128xf32>
    %51 = arith.addf %50, %15 : vector<64x128xf32>
    %c0_34 = arith.constant 0 : index
    %c0_35 = arith.constant 0 : index
    %52 = vector.load %arg13[%c0_34, %c0_35] : memref<1x128xf32, #tpu.memory_space<vmem>>, vector<1x128xf32>
    %53 = vector.broadcast %52 : vector<1x128xf32> to vector<64x128xf32>
    %54 = arith.addf %51, %53 : vector<64x128xf32>
    %cst_36 = arith.constant 0.000000e+00 : f32
    %55 = vector.broadcast %cst_36 : f32 to vector<64x128xf32>
    %56 = arith.maximumf %54, %55 : vector<64x128xf32>
    %57 = arith.truncf %56 : vector<64x128xf32> to vector<64x128xbf16>
    %c0_37 = arith.constant 0 : index
    %c0_38 = arith.constant 0 : index
    %c0_39 = arith.constant 0 : index
    %58 = vector.load %arg14[%c0_37, %c0_38, %c0_39] : memref<1x64x128xbf16, #tpu.memory_space<vmem>>, vector<1x64x128xbf16>
    %59 = vector.shape_cast %58 : vector<1x64x128xbf16> to vector<64x128xbf16>
    %60 = vector.shape_cast %57 : vector<64x128xbf16> to vector<1x64x128xbf16>
    tpu.vector_store %arg14[%c0_37, %c0_38, %c0_39], %60 {strides = array<i32>} : memref<1x64x128xbf16, #tpu.memory_space<vmem>>, vector<1x64x128xbf16>,
    return
  }
  func.func @transform_0(%arg0: i32, %arg1: i32) -> (i32, i32, i32) {
    %c0_i32 = arith.constant 0 : i32
    %c0_i32_0 = arith.constant 0 : i32
    return %arg0, %arg1, %c0_i32 : i32, i32, i32
  }
  func.func @transform_1(%arg0: i32, %arg1: i32) -> (i32, i32, i32) {
    %c0_i32 = arith.constant 0 : i32
    %c0_i32_0 = arith.constant 0 : i32
    %c0_i32_1 = arith.constant 0 : i32
    return %arg0, %c0_i32, %c0_i32_0 : i32, i32, i32
  }
  func.func @transform_2(%arg0: i32, %arg1: i32) -> (i32, i32, i32) {
    %c0_i32 = arith.constant 0 : i32
    %c0_i32_0 = arith.constant 0 : i32
    %c0_i32_1 = arith.constant 0 : i32
    return %arg0, %c0_i32, %c0_i32_0 : i32, i32, i32
  }
  func.func @transform_3(%arg0: i32, %arg1: i32) -> (i32, i32) {
    %c0_i32 = arith.constant 0 : i32
    %c0_i32_0 = arith.constant 0 : i32
    %c0_i32_1 = arith.constant 0 : i32
    return %c0_i32, %c0_i32_0 : i32, i32
  }
  func.func @transform_4(%arg0: i32, %arg1: i32) -> (i32, i32) {
    %c0_i32 = arith.constant 0 : i32
    %c0_i32_0 = arith.constant 0 : i32
    %c0_i32_1 = arith.constant 0 : i32
    return %c0_i32, %c0_i32_0 : i32, i32
  }
  func.func @transform_5(%arg0: i32, %arg1: i32) -> (i32, i32) {
    %c0_i32 = arith.constant 0 : i32
    %c0_i32_0 = arith.constant 0 : i32
    %c0_i32_1 = arith.constant 0 : i32
    return %c0_i32, %c0_i32_0 : i32, i32
  }
  func.func @transform_6(%arg0: i32, %arg1: i32) -> (i32, i32) {
    %c0_i32 = arith.constant 0 : i32
    %c0_i32_0 = arith.constant 0 : i32
    %c0_i32_1 = arith.constant 0 : i32
    return %c0_i32, %c0_i32_0 : i32, i32
  }
  func.func @transform_7(%arg0: i32, %arg1: i32) -> (i32, i32) {
    %c0_i32 = arith.constant 0 : i32
    %c0_i32_0 = arith.constant 0 : i32
    %c0_i32_1 = arith.constant 0 : i32
    return %c0_i32, %c0_i32_0 : i32, i32
  }
  func.func @transform_8(%arg0: i32, %arg1: i32) -> (i32, i32) {
    %c0_i32 = arith.constant 0 : i32
    %c0_i32_0 = arith.constant 0 : i32
    %c0_i32_1 = arith.constant 0 : i32
    return %c0_i32, %c0_i32_0 : i32, i32
  }
  func.func @transform_9(%arg0: i32, %arg1: i32) -> (i32, i32) {
    %c0_i32 = arith.constant 0 : i32
    %c0_i32_0 = arith.constant 0 : i32
    %c0_i32_1 = arith.constant 0 : i32
    return %c0_i32, %c0_i32_0 : i32, i32
  }
  func.func @transform_10(%arg0: i32, %arg1: i32) -> (i32, i32) {
    %c0_i32 = arith.constant 0 : i32
    %c0_i32_0 = arith.constant 0 : i32
    %c0_i32_1 = arith.constant 0 : i32
    return %c0_i32, %c0_i32_0 : i32, i32
  }
  func.func @transform_11(%arg0: i32, %arg1: i32) -> (i32, i32) {
    %c0_i32 = arith.constant 0 : i32
    %c0_i32_0 = arith.constant 0 : i32
    %c0_i32_1 = arith.constant 0 : i32
    return %c0_i32, %c0_i32_0 : i32, i32
  }
  func.func @transform_12(%arg0: i32, %arg1: i32) -> (i32, i32, i32) {
    %c0_i32 = arith.constant 0 : i32
    %c0_i32_0 = arith.constant 0 : i32
    return %arg0, %arg1, %c0_i32 : i32, i32, i32
  }
}

</mosaic_0001>

<bundles_post_ra>
// kernel: tpu_custom_call.1
= control target key start
LH: loop header
LB: loop body
LE: loop exit
PB: predicated region body
PF: predicated region fallthrough
CT: control target
= control target key end

     0   :  { %s3080_s0 = inlined_call_operand.hbm [shape: bf16[2,64,128], index: 0, kind: input, shape index: {}]   ;;  %s3081_s1 = inlined_call_operand.hbm [shape: bf16[2,16,128], index: 1, kind: input, shape index: {}]   ;;  %s3082_s2 = inlined_call_operand.hbm [shape: bf16[2,16,128], index: 2, kind: input, shape index: {}]   ;;  %s3083_s3 = inlined_call_operand.vmem [shape: f32[1,16], index: 3, kind: input, shape index: {}]   ;;  %s3084_s4 = inlined_call_operand.hbm [shape: bf16[128,256], index: 4, kind: input, shape index: {}]   ;;  %s3085_s5 = inlined_call_operand.vmem [shape: f32[1,128], index: 5, kind: input, shape index: {}]   ;;  %s3086_s6 = inlined_call_operand.hbm [shape: bf16[128,128], index: 6, kind: input, shape index: {}]   ;;  %s3087_s7 = inlined_call_operand.vmem [shape: f32[1,128], index: 7, kind: input, shape index: {}]   ;;  %s3088_s8 = inlined_call_operand.hbm [shape: bf16[128,128], index: 8, kind: input, shape index: {}]   ;;  %s3089_s9 = inlined_call_operand.vmem [shape: f32[1,128], index: 9, kind: input, shape index: {}]   ;;  %s3090_s10 = inlined_call_operand.hbm [shape: bf16[128,128], index: 10, kind: input, shape index: {}]   ;;  %s3091_s11 = inlined_call_operand.vmem [shape: f32[1,128], index: 11, kind: input, shape index: {}]   ;;  %s3092_s12 = inlined_call_operand.hbm [shape: bf16[2,64,128], index: 12, kind: output, shape index: {}]  }
   0x1   :  { %3124 = sst [smem:[#allocation30_spill]] %s3081_s1 }
   0x2   :  { %3125 = sst [smem:[#allocation31_spill]] %s3083_s3 }
   0x3   :  { %3126 = sst [smem:[#allocation32_spill]] %s3084_s4 }
   0x4   :  { %3127 = sst [smem:[#allocation33_spill]] %s3085_s5 }
   0x5   :  { %3128 = sst [smem:[#allocation34_spill]] %s3087_s7 }
   0x6   :  { %3129 = sst [smem:[#allocation35_spill]] %s3088_s8 }
   0x7   :  { %3130 = sst [smem:[#allocation36_spill]] %s3089_s9 }
   0x8   :  { %3131 = sst [smem:[#allocation37_spill]] %s3091_s11 }
   0x9   :  { %3132 = sst [smem:[#allocation38_spill]] %s3092_s12 }
   0xa   :  { %17 = vsyncpa [#allocation3], 0 }
   0xb   :  { %19 = vsyncpa [#allocation3 + $0x1], 0 }
   0xc   :  { %20 = vsyncpa [#allocation6], 0 }
   0xd   :  { %22 = vsyncpa [#allocation6 + $0x1], 0 }
   0xe   :  { %23 = vsyncpa [#allocation9], 0 }
   0xf   :  { %24 = vsyncpa [#allocation12], 0 }
  0x10   :  { %25 = vsyncpa [#allocation4], 0 }
  0x11   :  { %27 = vsyncpa [#allocation4 + $0x1], 0  ;;  %s2601_s21 = smov 0   ;;  %s2603_s22 = smov 0  }
  0x12   :  { %s2605_s23 = smov 0   ;;  %s2607_s24 = smov 0  }
  0x13   :  { %s2609_s25 = smov 0   ;;  %s2611_s26 = smov 0  }
  0x14 LB: > { %3133 = sst [smem:[#allocation20_spill]] %s2499_s21  ;;  %s2632_s27 = sadd.s32 4294967295, %s2519_s26   ;;  %s2519_s26 = sphi %s2611_s26, %s33_s26   ;;  %s2515_s25 = sphi %s2609_s25, %s3191_s25   ;;  %s2511_s24 = sphi %s2607_s24, %s3190_s24   ;;  %s2507_s23 = sphi %s2605_s23, %s3186_s23   ;;  %s2503_s22 = sphi %s2603_s22, %s3189_s22   ;;  %s2499_s21 = sphi %s2601_s21, %s3188_s21  }
  0x15   : > { %3134 = sst [smem:[#allocation21_spill]] %s2507_s23  ;;  %s1751_s28 = sadd.s32 4294967294, %s2519_s26  }
  0x16   : > { %3135 = sst [smem:[#allocation22_spill]] %s2511_s24  ;;  %p67_p0 = scmp.ne.s32.totalorder %s2503_s22, %s2499_s21 }
  0x17   : > { %3136 = sst [smem:[#allocation23_spill]] %s2519_s26  ;;  %p3096_p1 = scmp.eq.s32.totalorder %s2632_s27, 0 }
  0x18   : > { %3137 = sst [smem:[#allocation24_spill]] %s2632_s27  ;;  %p340_p3 = scmp.eq.s32.totalorder %s1751_s28, 1 }
  0x19   : > { %p2641_p4 = por %p3096_p1, %p67_p0  ;;  %p1752_p5 = scmp.ge.s32.totalorder %s2519_s26, 1 }
  0x1a   : > { %p2646_p6 = por %p340_p3, %p67_p0  ;;  %p347_p7 = scmp.lt.s32.totalorder %s2519_s26, 3 }
  0x1b   : > { %s3138_s29 = scalar_select %p2641_p4, 1, 0 }
  0x1c   : > { %s3140_s30 = scalar_select %p2646_p6, 1, 0 }
  0x1d   : > { %3139 = sst [smem:[#allocation25_spill]] %s3138_s29  ;;  %p2651_p8 = pnand %p1752_p5, %p347_p7 }
  0x1e   : > { %3141 = sst [smem:[#allocation26_spill]] %s3140_s30  ;;  %s2521_s14 = smov [#allocation8]  }
  0x1f   : > { %s3142_s13 = scalar_select %p2651_p8, 1, 0 }
  0x20   : > { %s362_s15 = sshll.u32 %s2521_s14, 4  ;;  %p2041_p9 = pneg %p2651_p8  ;;  %s363_s15 = int_to_ptr.vmem [resolvable:$true] %s362_s15 }
  0x21   : > { %s2522_s17 = smov [#allocation11]   ;;  %s3144_s4 = sld [smem:[#allocation32_spill]] }
  0x22   : > { %p2660_p11 = pnand %p2041_p9, %p3096_p1  ;;  %s394_s18 = sshll.u32 %s2522_s17, 4  ;;  %s395_s18 = int_to_ptr.vmem [resolvable:$true] %s394_s18 }
  0x24   : > { %s3143_s16 = scalar_select %p2660_p11, 1, 0 }
  0x25   : > { %p2672_p13 = pneg %p2660_p11 }
  0x27   : > { %s2223_s28 = scalar_lea.hbm %s3144_s4, 2048 }
  0x28   : > { %p2224_p12 = scmp.ne.s32.totalorder %s3144_s4, %s2223_s28  ;;  %p2230_p5 = scmp.lt.u32.totalorder %s2223_s28, %s3144_s4 }
  0x29   : > { %s3145_s14 = scalar_select %p2672_p13, 1, 0 }
  0x2a   : > { %p2226_p0 = pnand %p2672_p13, %p2224_p12 }
  0x2c   : > { %p2227_p3 = pneg %p2226_p0 }
  0x2e   : > { %p2232_p7 = pnand %p2230_p5, %p2227_p3 }
  0x30   : > { %2235 = shalt.err (!%p2232_p7)
}
  0x31   : > { %s2236_s17 = scalar_lea.vmem %s363_s15, 2048  ;;  %p2244_p2 = scmp.lt.s32.totalorder %s363_s15, %s363_s15 }
  0x32   : > { %p2237_p9 = scmp.ne.s32.totalorder %s363_s15, %s2236_s17  ;;  %p2245_p6 = scmp.lt.s32.totalorder %s2236_s17, %s2236_s17 }
  0x34   : > { %p2239_p10 = pnand %p2237_p9, %p2672_p13  ;;  %p2246_p4 = por %p2245_p6, %p2244_p2 }
  0x36   : > { %p2240_p1 = pneg %p2239_p10 }
  0x38   : > { %p2247_p8 = pnand %p2246_p4, %p2240_p1 }
  0x3a   : > { %2250 = shalt.err (!%p2247_p8)
}
  0x3b   : > { %s2523_s21 = smov 128   ;;  %s2524_s30 = smov 8  }
  0x3c   : > { %2044 = dma.hbm_to_vmem [thread:$0]  (!%p2660_p11), %s3144_s4, 2048, %s363_s15, [#allocation9], %s2523_s21, %s2523_s21, %s2524_s30  }
  0x3d   : > { %s3146_s8 = sld [smem:[#allocation35_spill]] }
  0x43   : > { %s2251_s28 = scalar_lea.hbm %s3146_s8, 1024 }
  0x44   : > { %p2252_p2 = scmp.ne.s32.totalorder %s3146_s8, %s2251_s28  ;;  %p2258_p6 = scmp.lt.u32.totalorder %s2251_s28, %s3146_s8 }
  0x46   : > { %p2254_p1 = pnand %p2252_p2, %p2672_p13 }
  0x48   : > { %p2255_p4 = pneg %p2254_p1 }
  0x4a   : > { %p2260_p8 = pnand %p2258_p6, %p2255_p4 }
  0x4c   : > { %2263 = shalt.err (!%p2260_p8)
}
  0x4d   : > { %s2264_s12 = scalar_lea.vmem %s395_s18, 1024  ;;  %p2272_p3 = scmp.lt.s32.totalorder %s395_s18, %s395_s18 }
  0x4e   : > { %p2265_p10 = scmp.ne.s32.totalorder %s395_s18, %s2264_s12  ;;  %p2273_p5 = scmp.lt.s32.totalorder %s2264_s12, %s2264_s12 }
  0x50   : > { %p2267_p12 = pnand %p2265_p10, %p2672_p13  ;;  %p2274_p7 = por %p2273_p5, %p2272_p3 }
  0x52   : > { %p2268_p0 = pneg %p2267_p12 }
  0x54   : > { %p2275_p9 = pnand %p2274_p7, %p2268_p0 }
  0x56   : > { %2278 = shalt.err (!%p2275_p9)
}
  0x57   : > { %s3099_s9 = smov 64   ;;  %s3101_s3 = smov 4  }
  0x58   : > { %2050 = dma.hbm_to_vmem [thread:$0]  (!%p2660_p11), %s3146_s8, 1024, %s395_s18, [#allocation12], %s3099_s9, %s3099_s9, %s3101_s3  }
  0x59   : > { %s45_s21 = sadd.s32 1, %s2515_s25  ;;  %s54_s30 = sadd.s32 1, %s2507_s23 }
  0x5a   : > { %p47_p2 = scmp.ge.s32.totalorder %s45_s21, 2  ;;  %p61_p1 = scmp.ne.s32.totalorder %s2507_s23, %s2503_s22 }
  0x5b   : > { %p62_p4 = scmp.eq.s32.totalorder %s2519_s26, 0  ;;  %p2072_p6 = scmp.lt.s32.totalorder %s2519_s26, 2 }
  0x5c   : > { %s3193_s21 = smov (%p47_p2, %s45_s21), 0  ;;  %p3148_p10 = scmp.eq.s32.totalorder %s2632_s27, 1 }
  0x5d   : > { %3147 = sst [smem:[#allocation27_spill]] %s3193_s21  ;;  %p63_p8 = por %p62_p4, %p61_p1 }
  0x5e   : > { %p2719_p12 = por %p3148_p10, %p61_p1  ;;  %s49_s19 = ssub.s32 %s2515_s25, %s3193_s21 }
  0x5f   : > { %s2726_s18 = sand.u32 1, %s2507_s23   ;;  %p52_p0 = scmp.eq.s32.totalorder %s49_s19, 0 }
  0x60   : > { %s3149_s24 = scalar_select %p2719_p12, 1, 0 }
  0x61   : > { %p2728_p3 = pnand %p2072_p6, %p63_p8  ;;  %s450_s28 = sand.u32 1, %s2519_s26  }
  0x62   : > { %3150 = sst [smem:[#allocation28_spill]] %s3149_s24  ;;  %s3104_s17 = sshll.u32 %s2726_s18, 3 }
  0x63   : > { %s3151_s20 = scalar_select %p2728_p3, 1, 0 }
  0x64   : > { %s2735_s12 = scalar_select %p52_p0, %s2507_s23, %s54_s30  }
  0x65   : > { %s3105_s11 = sshll.u32 %s2515_s25, 7  ;;  %s3153_s1 = sld [smem:[#allocation30_spill]] }
  0x66   : > { %3152 = sst [smem:[#allocation29_spill]] %s2735_s12  ;;  %s454_s19 = scalar_lea.vmem [#allocation5], %s3104_s17 }
  0x67   : > { %s461_s4 = sshll.u32 %s454_s19, 4  ;;  %s2749_s8 = scalar_lea.sflag [#allocation6], %s450_s28  ;;  %s2747_s4 = int_to_ptr.vmem [resolvable:$true] %s461_s4 }
  0x68   : > { %p2755_p7 = pneg %p2728_p3 }
  0x6a   : > { %s3154_s21 = scalar_select %p2755_p7, 1, 0 }
  0x6b   : > { %s2743_s3 = scalar_lea.hbm %s3153_s1, %s3105_s11  ;;  %s2284_s17 = scalar_lea.hbm %s3153_s1, 256 }
  0x6c   : > { %s2279_s30 = scalar_lea.hbm %s2743_s3, 128  ;;  %p2285_p1 = scmp.lt.u32.totalorder %s2743_s3, %s3153_s1 }
  0x6d   : > { %p2280_p5 = scmp.ne.s32.totalorder %s2743_s3, %s2279_s30  ;;  %p2286_p4 = scmp.lt.u32.totalorder %s2284_s17, %s2279_s30 }
  0x6e   : > { %p2288_p8 = scmp.lt.u32.totalorder %s2279_s30, %s2743_s3 }
  0x6f   : > { %p2282_p9 = pnand %p2755_p7, %p2280_p5  ;;  %p2287_p6 = por %p2286_p4, %p2285_p1 }
  0x71   : > { %p2283_p2 = pneg %p2282_p9  ;;  %p2289_p10 = por %p2288_p8, %p2287_p6 }
  0x73   : > { %p2290_p0 = pnand %p2289_p10, %p2283_p2 }
  0x75   : > { %2293 = shalt.err (!%p2290_p0)
}
  0x76   : > { %s2294_s28 = scalar_lea.vmem %s2747_s4, 128  ;;  %s2527_s9 = smov [#allocation5]  }
  0x77   : > { %p2295_p5 = scmp.ne.s32.totalorder %s2747_s4, %s2294_s28  ;;  %s2299_s15 = sshll.u32 %s2527_s9, 4  ;;  %s2300_s15 = int_to_ptr.vmem [resolvable:$false] %s2299_s15 }
  0x78   : > { %s2301_s11 = scalar_lea.vmem %s2300_s15, 256  ;;  %p2302_p11 = scmp.lt.s32.totalorder %s2747_s4, %s2300_s15 }
  0x79   : > { %p2297_p9 = pnand %p2295_p5, %p2755_p7  ;;  %p2303_p13 = scmp.lt.s32.totalorder %s2301_s11, %s2294_s28 }
  0x7b   : > { %p2298_p12 = pneg %p2297_p9  ;;  %p2304_p1 = por %p2303_p13, %p2302_p11 }
  0x7d   : > { %p2305_p4 = pnand %p2304_p1, %p2298_p12 }
  0x7f   : > { %2308 = shalt.err (!%p2305_p4)
}
  0x80   : > { %s3155_s17 = smov 4   ;;  %s3156_s30 = smov 64  }
  0x81   : > { %2060 = dma.hbm_to_vmem [thread:$0]  (!%p2728_p3), %s2743_s3, 128, %s2747_s4, %s2749_s8, %s3156_s30, %s3156_s30, %s3155_s17  }
  0x82   : > { %s3157_s19 = sshll.u32 %s2515_s25, 7  ;;  %s3158_s15 = sshll.u32 %s2726_s18, 3 }
  0x83   : > { %s2787_s28 = scalar_lea.hbm %s3082_s2, %s3157_s19  ;;  %s2791_s11 = scalar_lea.vmem [#allocation7], %s3158_s15 }
  0x84   : > { %s482_s12 = sshll.u32 %s2791_s11, 4  ;;  %s2528_s23 = smov [#allocation10]   ;;  %s2845_s12 = int_to_ptr.vmem [resolvable:$true] %s482_s12 }
  0x85   : > { %s378_s26 = sshll.u32 %s2528_s23, 4  ;;  %s2529_s24 = smov [#allocation13]   ;;  %s379_s26 = int_to_ptr.vmem [resolvable:$true] %s378_s26 }
  0x86   : > { %s410_s7 = sshll.u32 %s2529_s24, 4  ;;  %s2309_s4 = scalar_lea.hbm %s3086_s6, 1024  ;;  %s411_s7 = int_to_ptr.vmem [resolvable:$true] %s410_s7 }
  0x87   : > { %p2310_p11 = scmp.ne.s32.totalorder %s3086_s6, %s2309_s4  ;;  %p3159_p13 = scmp.ne.s32.totalorder %s3145_s14, 0 }
  0x88   : > { %p2316_p6 = scmp.lt.u32.totalorder %s2309_s4, %s3086_s6 }
  0x89   : > { %p2312_p12 = pnand %p2310_p11, %p3159_p13 }
  0x8b   : > { %p2313_p2 = pneg %p2312_p12 }
  0x8d   : > { %p2318_p8 = pnand %p2316_p6, %p2313_p2 }
  0x8f   : > { %2321 = shalt.err (!%p2318_p8)
}
  0x90   : > { %s2322_s23 = scalar_lea.vmem %s379_s26, 1024  ;;  %p2330_p9 = scmp.lt.s32.totalorder %s379_s26, %s379_s26 }
  0x91   : > { %p2323_p10 = scmp.ne.s32.totalorder %s379_s26, %s2322_s23  ;;  %p2331_p1 = scmp.lt.s32.totalorder %s2322_s23, %s2322_s23 }
  0x93   : > { %p2325_p0 = pnand %p2323_p10, %p3159_p13  ;;  %p2332_p4 = por %p2331_p1, %p2330_p9 }
  0x95   : > { %p2326_p5 = pneg %p2325_p0 }
  0x97   : > { %p2333_p3 = pnand %p2332_p4, %p2326_p5 }
  0x99   : > { %2336 = shalt.err (!%p2333_p3)
}
  0x9a   : > { %p3160_p11 = scmp.ne.s32.totalorder %s3143_s16, 0  ;;  %s2337_s9 = scalar_lea.hbm %s3090_s10, 1024 }
  0x9b   : > { %p2338_p12 = scmp.ne.s32.totalorder %s3090_s10, %s2337_s9  ;;  %p2344_p6 = scmp.lt.u32.totalorder %s2337_s9, %s3090_s10 }
  0x9c   : > { %2047 = dma.hbm_to_vmem [thread:$0]  (!%p3160_p11), %s3086_s6, 1024, %s379_s26, [#allocation9], %s3156_s30, %s3156_s30, %s3155_s17  }
  0x9d   : > { %p2340_p3 = pnand %p2338_p12, %p3159_p13 }
  0x9f   : > { %p2341_p2 = pneg %p2340_p3 }
  0xa1   : > { %p2346_p8 = pnand %p2344_p6, %p2341_p2 }
  0xa3   : > { %2349 = shalt.err (!%p2346_p8)
}
  0xa4   : > { %s2350_s19 = scalar_lea.vmem %s411_s7, 1024  ;;  %p2358_p9 = scmp.lt.s32.totalorder %s411_s7, %s411_s7 }
  0xa5   : > { %p2351_p10 = scmp.ne.s32.totalorder %s411_s7, %s2350_s19  ;;  %p2359_p1 = scmp.lt.s32.totalorder %s2350_s19, %s2350_s19 }
  0xa7   : > { %p2353_p0 = pnand %p2351_p10, %p3159_p13  ;;  %p2360_p4 = por %p2359_p1, %p2358_p9 }
  0xa9   : > { %p2354_p5 = pneg %p2353_p0 }
  0xab   : > { %p2361_p7 = pnand %p2360_p4, %p2354_p5 }
  0xad   : > { %2364 = shalt.err (!%p2361_p7)
}
  0xae   : > { %2053 = dma.hbm_to_vmem [thread:$0]  (!%p3160_p11), %s3090_s10, 1024, %s411_s7, [#allocation12], %s3156_s30, %s3156_s30, %s3155_s17  }
  0xaf   : > { %s1758_s14 = sshll.u32 %s2726_s18, 5  ;;  %s1844_s5 = sshll.u32 %s2515_s25, 9 }
  0xb0   : > { %s2841_s24 = scalar_lea.hbm %s3080_s0, %s1844_s5  ;;  %s431_s16 = scalar_lea.vmem [#allocation2], %s1758_s14 }
  0xb1   : > { %s440_s9 = sshll.u32 %s431_s16, 4  ;;  %s428_s15 = scalar_lea.sflag [#allocation3], %s2726_s18  ;;  %s2847_s9 = int_to_ptr.vmem [resolvable:$true] %s440_s9 }
  0xb2   : > { %s2365_s7 = scalar_lea.hbm %s2841_s24, 512  ;;  %p3161_p13 = scmp.ne.s32.totalorder %s3154_s21, 0 }
  0xb3   : > { %p2366_p7 = scmp.ne.s32.totalorder %s2841_s24, %s2365_s7  ;;  %s2370_s11 = scalar_lea.hbm %s3080_s0, 1024 }
  0xb4   : > { %p2371_p3 = scmp.lt.u32.totalorder %s2841_s24, %s3080_s0  ;;  %p2372_p2 = scmp.lt.u32.totalorder %s2370_s11, %s2365_s7 }
  0xb5   : > { %p2368_p11 = pnand %p2366_p7, %p3161_p13  ;;  %p2374_p8 = scmp.lt.u32.totalorder %s2365_s7, %s2841_s24 }
  0xb6   : > { %p2373_p6 = por %p2372_p2, %p2371_p3 }
  0xb7   : > { %p2369_p12 = pneg %p2368_p11 }
  0xb8   : > { %p2375_p10 = por %p2374_p8, %p2373_p6 }
  0xba   : > { %p2376_p0 = pnand %p2375_p10, %p2369_p12 }
  0xbc   : > { %2379 = shalt.err (!%p2376_p0)
}
  0xbd   : > { %s2380_s26 = scalar_lea.vmem %s2847_s9, 512  ;;  %s2530_s23 = smov [#allocation2]  }
  0xbe   : > { %p2381_p5 = scmp.ne.s32.totalorder %s2847_s9, %s2380_s26  ;;  %s2385_s14 = sshll.u32 %s2530_s23, 4  ;;  %s2386_s14 = int_to_ptr.vmem [resolvable:$false] %s2385_s14 }
  0xbf   : > { %s2387_s5 = scalar_lea.vmem %s2386_s14, 1024  ;;  %p2388_p4 = scmp.lt.s32.totalorder %s2847_s9, %s2386_s14 }
  0xc0   : > { %p2383_p9 = pnand %p2381_p5, %p3161_p13  ;;  %p2389_p7 = scmp.lt.s32.totalorder %s2387_s5, %s2380_s26 }
  0xc2   : > { %p2384_p1 = pneg %p2383_p9  ;;  %p2390_p11 = por %p2389_p7, %p2388_p4 }
  0xc4   : > { %p2391_p3 = pnand %p2390_p11, %p2384_p1 }
  0xc6   : > { %2394 = shalt.err (!%p2391_p3)
}
  0xc7   : > { %p3162_p12 = scmp.ne.s32.totalorder %s3151_s20, 0  ;;  %s2395_s27 = scalar_lea.hbm %s2787_s28, 128 }
  0xc8   : > { %p2396_p2 = scmp.ne.s32.totalorder %s2787_s28, %s2395_s27  ;;  %s2400_s7 = scalar_lea.hbm %s3082_s2, 256 }
  0xc9   : > { %2057 = dma.hbm_to_vmem [thread:$0]  (!%p3162_p12), %s2841_s24, 512, %s2847_s9, %s428_s15, %s3156_s30, %s3156_s30, %s3155_s17  }
  0xca   : > { %p2398_p6 = pnand %p2396_p2, %p3161_p13  ;;  %p2401_p10 = scmp.lt.u32.totalorder %s2787_s28, %s3082_s2 }
  0xcb   : > { %p2402_p0 = scmp.lt.u32.totalorder %s2400_s7, %s2395_s27  ;;  %p2404_p9 = scmp.lt.u32.totalorder %s2395_s27, %s2787_s28 }
  0xcc   : > { %p2399_p8 = pneg %p2398_p6 }
  0xcd   : > { %p2403_p5 = por %p2402_p0, %p2401_p10 }
  0xcf   : > { %p2405_p1 = por %p2404_p9, %p2403_p5 }
  0xd1   : > { %p2406_p4 = pnand %p2405_p1, %p2399_p8 }
  0xd3   : > { %2409 = shalt.err (!%p2406_p4)
}
  0xd4   : > { %s2410_s18 = scalar_lea.vmem %s2845_s12, 128  ;;  %s2531_s24 = smov [#allocation7]  }
  0xd5   : > { %p2411_p7 = scmp.ne.s32.totalorder %s2845_s12, %s2410_s18  ;;  %s2415_s9 = sshll.u32 %s2531_s24, 4  ;;  %s2416_s9 = int_to_ptr.vmem [resolvable:$false] %s2415_s9 }
  0xd6   : > { %s2417_s15 = scalar_lea.vmem %s2416_s9, 256  ;;  %p2418_p2 = scmp.lt.s32.totalorder %s2845_s12, %s2416_s9 }
  0xd7   : > { %p2413_p11 = pnand %p2411_p7, %p3161_p13  ;;  %p2419_p6 = scmp.lt.s32.totalorder %s2417_s15, %s2410_s18 }
  0xd9   : > { %p2414_p3 = pneg %p2413_p11  ;;  %p2420_p10 = por %p2419_p6, %p2418_p2 }
  0xdb   : > { %p2421_p0 = pnand %p2420_p10, %p2414_p3 }
  0xdd   : > { %2424 = shalt.err (!%p2421_p0)
}
  0xde   : > { %2063 = dma.hbm_to_vmem [thread:$0]  (!%p3162_p12), %s2787_s28, 128, %s2845_s12, %s2749_s8, %s3156_s30, %s3156_s30, %s3155_s17  }
  0xdf   : > { %p3163_p13 = scmp.ne.s32.totalorder %s3142_s13, 0 }
  0xe0   : > { %s3164_s21 = sld [smem:[#allocation25_spill]] (!%p3163_p13)  ;;  %s2904_s11 = sand.u32 (!%p3163_p13), 1, %s2503_s22  }
  0xe1   : > { %494 = sbr.rel (%p3163_p13) target bundleno = 1963 (0x7ab), region = 68  ;;  %s1768_s1 = sshll.u32 (!%p3163_p13), %s2904_s11, 5 }
  0xe2   : > { %s497_s19 = scalar_lea.sflag (!%p3163_p13), [#allocation3], %s2904_s11  ;;  %s2910_s20 = scalar_lea.vmem (!%p3163_p13), [#allocation2], %s1768_s1 }
  0xe6   : > { %p3165_p8 = scmp.ne.s32.totalorder (!%p3163_p13), %s3164_s21, 0 }
  0xe8   : > { %2478 = dma.done.wait (%p3165_p8), %s497_s19, 512  }
  0xe9   : > { %2480 = vsyncadd (%p3165_p8), %s497_s19, 4294966784  ;;  %s3166_s8 = sld [smem:[#allocation24_spill]]  ;;  %s1769_s12 = sshll.u32 %s2904_s11, 3 }
  0xea   : > { %s2918_s30 = scalar_lea.vmem [#allocation5], %s1769_s12 }
  0xef   : > { %s505_s13 = sand.u32 1, %s3166_s8  }
  0xf0   : > { %s506_s17 = scalar_lea.sflag [#allocation6], %s505_s13 }
  0xf1   : > { %2482 = dma.done.wait (%p3165_p8), %s506_s17, 256  }
  0xf2   : > { %2484 = vsyncadd (%p3165_p8), %s506_s17, 4294967040  ;;  %s2924_s28 = scalar_lea.vmem [#allocation7], %s1769_s12  ;;  %p3167_p12 = scmp.eq.s32.totalorder %s3166_s8, 0 }
  0xf4   : > { %2486 = dma.done.wait (%p3167_p12), [#allocation9], 3072   ;;  %p3168_p5 = pmov %p3167_p12 }
  0xf6   : > { %2488 = vsyncadd (%p3168_p5), [#allocation9], 4294964224  ;;  %p3169_p9 = pmov %p3168_p5 }
  0xf7   : > { %p3170_p1 = pmov %p3168_p5 }
  0xf8   : > { %2490 = dma.done.wait (%p3169_p9), [#allocation12], 2048  }
  0xf9   : > { %2492 = vsyncadd (%p3170_p1), [#allocation12], 4294965248  ;;  %v2532_v0 = vmov 0   ;;  %v2137_v1 = vld [vmem:[#allocation8 + $0x4] ss:$8 sps:$4 sm:$0xff]   ;;  %v2167_v16 = vld [vmem:[#allocation10 + $0x10] sm:$0xff]  }
  0xfa   : > { %752 = vmatprep.mubr.bf16.mxu0 %v2532_v0  ;;  %v2139_v2 = vld [vmem:[#allocation8] ss:$8 sps:$4 sm:$0xff]   ;;  %720 = vmatprep.subr.bf16.mxu0 %v2137_v1  ;;  %v2140_v3 = vld [vmem:[#allocation8 + $0x14] ss:$8 sps:$4 sm:$0xff]   ;;  %v2142_v4 = vld [vmem:[#allocation8 + $0x10] ss:$8 sps:$4 sm:$0xff]  }
  0xfb   : > { %721 = vmatpush1.bf16.msra.mxu0 %v2139_v2  ;;  %v2143_v5 = vld [vmem:[#allocation8 + $0x24] ss:$8 sps:$4 sm:$0xff]   ;;  %v2145_v6 = vld [vmem:[#allocation8 + $0x20] ss:$8 sps:$4 sm:$0xff]   ;;  %v2146_v7 = vld [vmem:[#allocation8 + $0x34] ss:$8 sps:$4 sm:$0xff]  }
  0xfc   : > { %722 = vmatprep.subr.bf16.mxu0 %v2140_v3  ;;  %v2148_v8 = vld [vmem:[#allocation8 + $0x30] ss:$8 sps:$4 sm:$0xff]   ;;  %v2149_v9 = vld [vmem:[#allocation8 + $0x44] ss:$8 sps:$4 sm:$0xff]   ;;  %v2151_v10 = vld [vmem:[#allocation8 + $0x40] ss:$8 sps:$4 sm:$0xff]  }
  0xfd   : > { %v2152_v11 = vld [vmem:[#allocation8 + $0x54] ss:$8 sps:$4 sm:$0xff]   ;;  %v2165_v12 = vld [vmem:[#allocation10] sm:$0xff]   ;;  %v2166_v13 = vld [vmem:[#allocation10 + $0x8] sm:$0xff]   ;;  %s3171_s14 = sld [smem:[#allocation33_spill]]  ;;  %s3172_s29 = sld [smem:[#allocation34_spill]] }
  0xfe   : > { %v2154_v14 = vld [vmem:[#allocation8 + $0x50] ss:$8 sps:$4 sm:$0xff]   ;;  %1925 = vmatprep.subr.bf16.mxu1 %v2165_v12  ;;  %v2155_v15 = vld [vmem:[#allocation8 + $0x64] ss:$8 sps:$4 sm:$0xff]   ;;  %v2157_v17 = vld [vmem:[#allocation8 + $0x60] ss:$8 sps:$4 sm:$0xff]  }
  0xff   : > { %723 = vmatpush1.bf16.msra.mxu0 %v2142_v4  ;;  %1926 = vmatpush3.bf16.msra.mxu1 %v2165_v12  ;;  %v2168_v18 = vld [vmem:[#allocation10 + $0x18] sm:$0xff]   ;;  %v2161_v21 = vld [vmem:[%s2910_s20] sm:$0xff]   ;;  %v2162_v22 = vld [vmem:[%s2910_s20 + $0x8] sm:$0xff]   ;;  %s3173_s4 = sld [smem:[#allocation31_spill]]  ;;  %vm1046_vm0 = vcmask 130048   ;;  %s3174_s24 = sld [smem:[#allocation36_spill]] }
 0x100   : > { %724 = vmatprep.subr.bf16.mxu0 %v2143_v5  ;;  %1927 = vmatprep.subr.bf16.mxu1 %v2166_v13  ;;  %v2158_v19 = vld [vmem:[#allocation8 + $0x74] ss:$8 sps:$4 sm:$0xff]   ;;  %v2160_v20 = vld [vmem:[#allocation8 + $0x70] ss:$8 sps:$4 sm:$0xff]   ;;  %v2169_v25 = vld [vmem:[#allocation10 + $0x20] sm:$0xff]   ;;  %s3175_s21 = sld [smem:[#allocation37_spill]] }
 0x101   : > { %v2163_v23 = vld [vmem:[%s2910_s20 + $0x10] sm:$0xff]   ;;  %v2164_v24 = vld [vmem:[%s2910_s20 + $0x18] sm:$0xff]   ;;  %v2170_v26 = vld [vmem:[#allocation10 + $0x28] sm:$0xff]   ;;  %s584_s19 = scalar_lea.vmem [#allocation14], %s1768_s1  ;;  %s3176_s20 = sld [smem:[#allocation22_spill]] }
 0x102   : > { %v2171_v27 = vld [vmem:[#allocation10 + $0x30] sm:$0xff]   ;;  %v2172_v28 = vld [vmem:[#allocation10 + $0x38] sm:$0xff]   ;;  %v2173_v2 = vld [vmem:[%s2918_s30] sm:$0xff]   ;;  %s1582_s8 = sshll.u32 %s584_s19, 4  ;;  %s3177_s1 = sld [smem:[#allocation28_spill]]  ;;  %s3026_s8 = int_to_ptr.vmem [resolvable:$true] %s1582_s8 }
 0x103   : > { %725 = vmatpush1.bf16.msra.mxu0 %v2145_v6  ;;  %1928 = vmatpush3.bf16.msra.mxu1 %v2166_v13  ;;  %v1796_v29 = vld [vmem:[%s3171_s14] ss:$0 sm:$0xff]  ;;  %s3178_s30 = sld [smem:[#allocation38_spill]]  ;;  %s1567_s26 = scalar_lea.sflag [#allocation4], %s2904_s11 }
 0x104   : > { %726 = vmatprep.subr.bf16.mxu0 %v2146_v7  ;;  %1929 = vmatprep.subr.bf16.mxu1 %v2167_v16  ;;  %v1797_v3 = vld [vmem:[%s3172_s29] ss:$0 sm:$0xff]  ;;  %s2425_s23 = scalar_lea.vmem %s3026_s8, 512  ;;  %s2533_s14 = smov [#allocation14]  }
 0x105   : > { %p2426_p4 = scmp.ne.s32.totalorder %s3026_s8, %s2425_s23  ;;  %s2429_s5 = sshll.u32 %s2533_s14, 4  ;;  %s2430_s5 = int_to_ptr.vmem [resolvable:$false] %s2429_s5 }
 0x106   : > { %s2431_s27 = scalar_lea.vmem %s2430_s5, 1024  ;;  %p2432_p2 = scmp.lt.s32.totalorder %s3026_s8, %s2430_s5 }
 0x107   : > { %727 = vmatpush1.bf16.msra.mxu0 %v2148_v8  ;;  %1930 = vmatpush3.bf16.msra.mxu1 %v2167_v16  ;;  %s1855_s13 = sshll.u32 %s3176_s20, 9  ;;  %p2433_p6 = scmp.lt.s32.totalorder %s2431_s27, %s2425_s23 }
 0x108   : > { %728 = vmatprep.subr.bf16.mxu0 %v2149_v9  ;;  %1931 = vmatprep.subr.bf16.mxu1 %v2168_v18  ;;  %p3179_p7 = scmp.ne.s32.totalorder %s3177_s1, 0 }
 0x109   : > { %p2434_p10 = por %p2433_p6, %p2432_p2 }
 0x10a   : > { %p2427_p11 = pnand %p2426_p4, %p3179_p7 }
 0x10b   : > { %729 = vmatpush1.bf16.msra.mxu0 %v2151_v10  ;;  %1932 = vmatpush3.bf16.msra.mxu1 %v2168_v18 }
 0x10c   : > { %730 = vmatprep.subr.bf16.mxu0 %v2152_v11  ;;  %1933 = vmatprep.subr.bf16.mxu1 %v2169_v25  ;;  %p2428_p3 = pneg %p2427_p11 }
 0x10e   : > { %p2435_p0 = pnand %p2434_p10, %p2428_p3 }
 0x10f   : > { %731 = vmatpush1.bf16.msra.mxu0 %v2154_v14  ;;  %1934 = vmatpush3.bf16.msra.mxu1 %v2169_v25 }
 0x110   : > { %732 = vmatprep.subr.bf16.mxu0 %v2155_v15  ;;  %1935 = vmatprep.subr.bf16.mxu1 %v2170_v26 }
 0x113   : > { %733 = vmatpush1.bf16.msra.mxu0 %v2157_v17  ;;  %1936 = vmatpush3.bf16.msra.mxu1 %v2170_v26 }
 0x114   : > { %734 = vmatprep.subr.bf16.mxu0 %v2158_v19  ;;  %1937 = vmatprep.subr.bf16.mxu1 %v2171_v27 }
 0x117   : > { %735 = vmatpush1.bf16.msra.mxu0 %v2160_v20  ;;  %1938 = vmatpush3.bf16.msra.mxu1 %v2171_v27 }
 0x118   : > { %1939 = vmatprep.subr.bf16.mxu1 %v2172_v28 }
 0x11a   : > { %753 = vmatmul.mubr.bf16.vlgmr.msra.gmra.mrb[0].mxu0 %v2161_v21 }
 0x11b   : > { %762 = vmatprep.mubr.bf16.mxu0 %v2532_v0  ;;  %1940 = vmatpush3.bf16.msra.mxu1 %v2172_v28 }
 0x11c   : > { %1949 = vmatprep.subr.bf16.mxu1 %v2173_v2 }
 0x122   : > { %763 = vmatmul.mubr.bf16.gmra.mrb[4].mxu0 %v2162_v22 }
 0x123   : > { %772 = vmatprep.mubr.bf16.mxu0 %v2532_v0 }
 0x12a   : > { %773 = vmatmul.mubr.bf16.gmra.mrb[8].mxu0 %v2163_v23 }
 0x12b   : > { %782 = vmatprep.mubr.bf16.mxu0 %v2532_v0 }
 0x132   : > { %783 = vmatmul.mubr.bf16.gmra.mrb[12].mxu0 %v2164_v24 }
 0x1ed   : > { %v754_v30 = vpop.f32.mrb[0].mxu0 }
 0x1ee   : > { %v800_v31 = vadd.f32 %v1796_v29, %v754_v30  ;;  %v2941_v32 = vpop.f32.mrb[1].mxu0 }
 0x1ef   : > { %v758_v33 = vpop.f32.mrb[2].mxu0 }
 0x1f0   : > { %v801_v34 = vadd.f32 %v1796_v29, %v758_v33  ;;  %v2943_v35 = vpop.f32.mrb[3].mxu0  ;;  %v808_v36 = vmax.f32 %v800_v31, 0.0  ;;  %v1806_v33 = vld [vmem:[%s3173_s4] ss:$0 sm:$0xff] }
 0x1f2   : > { %v809_v37 = vmax.f32 %v801_v34, 0.0 }
 0x1f4   : > { %v816_v38 = vpack.c.bf16 %v809_v37, %v808_v36 }
 0x1f5   : > { %v764_v39 = vpop.f32.mrb[4].mxu0 }
 0x1f6   : > { %v802_v40 = vadd.f32 %v1796_v29, %v764_v39  ;;  %v2945_v41 = vpop.f32.mrb[5].mxu0  ;;  %1941 = vmatprep.mubr.bf16.mxu1 %v816_v38 }
 0x1f7   : > { %v768_v42 = vpop.f32.mrb[6].mxu0 }
 0x1f8   : > { %v803_v43 = vadd.f32 %v1796_v29, %v768_v42  ;;  %v2947_v44 = vpop.f32.mrb[7].mxu0  ;;  %v810_v45 = vmax.f32 %v802_v40, 0.0 }
 0x1fa   : > { %v811_v46 = vmax.f32 %v803_v43, 0.0 }
 0x1fc   : > { %v817_v47 = vpack.c.bf16 %v811_v46, %v810_v45 }
 0x1fd   : > { %v774_v48 = vpop.f32.mrb[8].mxu0 }
 0x1fe   : > { %v804_v49 = vadd.f32 %v1796_v29, %v774_v48  ;;  %v2949_v50 = vpop.f32.mrb[9].mxu0  ;;  %1942 = vmatmul.mubr.bf16.vlgmr.msra.gmra.mrb[0].mxu1 %v817_v47 }
 0x1ff   : > { %v778_v51 = vpop.f32.mrb[10].mxu0  ;;  %1950 = vmatpush3.bf16.xpose.msra.mxu1 %v2173_v2 }
 0x200   : > { %v805_v52 = vadd.f32 %v1796_v29, %v778_v51  ;;  %v2951_v53 = vpop.f32.mrb[11].mxu0  ;;  %v812_v54 = vmax.f32 %v804_v49, 0.0 }
 0x202   : > { %v813_v55 = vmax.f32 %v805_v52, 0.0 }
 0x204   : > { %v818_v56 = vpack.c.bf16 %v813_v55, %v812_v54 }
 0x205   : > { %v784_v57 = vpop.f32.mrb[12].mxu0 }
 0x206   : > { %v806_v58 = vadd.f32 %v1796_v29, %v784_v57  ;;  %v2953_v59 = vpop.f32.mrb[13].mxu0  ;;  %1945 = vmatprep.mubr.bf16.mxu1 %v818_v56 }
 0x207   : > { %v788_v60 = vpop.f32.mrb[14].mxu0 }
 0x208   : > { %v807_v61 = vadd.f32 %v1796_v29, %v788_v60  ;;  %v2955_v62 = vpop.f32.mrb[15].mxu0  ;;  %v814_v63 = vmax.f32 %v806_v58, 0.0 }
 0x20a   : > { %v815_v0 = vmax.f32 %v807_v61, 0.0 }
 0x20c   : > { %v819_v1 = vpack.c.bf16 %v815_v0, %v814_v63 }
 0x20e   : > { %1946 = vmatmul.mubr.bf16.gmra.mrb[4].mxu1 %v819_v1  ;;  %v2174_v1 = vld [vmem:[%s2924_s28] sm:$0xff]   ;;  %s3031_s28 = scalar_lea.hbm %s3178_s30, %s1855_s13 }
 0x20f   : > { %1959 = vmatprep.subr.bf16.mxu0 %v2174_v1 }
 0x210   : > { %1960 = vmatpush3.bf16.msra.mxu0 %v2174_v1 }
 0x2d1   : > { %v1943_v4 = vpop.f32.mrb[0].mxu1 }
 0x2d2   : > { %v934_v5 = vadd.f32 %v1943_v4, %v1797_v3  ;;  %v925_v6 = vpop.f32.mrb[1].mxu1 }
 0x2d3   : > { %v926_v7 = vadd.f32 %v1797_v3, %v925_v6  ;;  %v1944_v8 = vpop.f32.mrb[2].mxu1 }
 0x2d4   : > { %v937_v9 = vadd.f32 %v1944_v8, %v1797_v3  ;;  %v928_v10 = vpop.f32.mrb[3].mxu1  ;;  %v958_v12 = vmax.f32 %v934_v5, 0.0 }
 0x2d5   : > { %v929_v11 = vadd.f32 %v1797_v3, %v928_v10  ;;  %v956_v14 = vmax.f32 %v926_v7, 0.0 }
 0x2d6   : > { %v959_v13 = vmax.f32 %v937_v9, 0.0 }
 0x2d7   : > { %v957_v15 = vmax.f32 %v929_v11, 0.0 }
 0x2d8   : > { %v965_v16 = vpack.c.bf16 %v959_v13, %v958_v12 }
 0x2d9   : > { %v964_v17 = vpack.c.bf16 %v957_v15, %v956_v14 }
 0x2db   : > { %1951 = vmatprep.mubr.bf16.mxu1 %v964_v17 }
 0x2dc   : > { %1952 = vmatmul.mubr.bf16.vlgmr.msra.gmra.mrb[8].mxu1 %v965_v16 }
 0x2e1   : > { %v1947_v18 = vpop.f32.mrb[4].mxu1 }
 0x2e2   : > { %v950_v19 = vadd.f32 %v1947_v18, %v1797_v3  ;;  %v941_v20 = vpop.f32.mrb[5].mxu1 }
 0x2e3   : > { %v942_v21 = vadd.f32 %v1797_v3, %v941_v20  ;;  %v1948_v22 = vpop.f32.mrb[6].mxu1 }
 0x2e4   : > { %v953_v23 = vadd.f32 %v1948_v22, %v1797_v3  ;;  %v944_v24 = vpop.f32.mrb[7].mxu1  ;;  %v962_v26 = vmax.f32 %v950_v19, 0.0 }
 0x2e5   : > { %v945_v25 = vadd.f32 %v1797_v3, %v944_v24  ;;  %v960_v28 = vmax.f32 %v942_v21, 0.0 }
 0x2e6   : > { %v963_v27 = vmax.f32 %v953_v23, 0.0 }
 0x2e7   : > { %v961_v29 = vmax.f32 %v945_v25, 0.0 }
 0x2e8   : > { %v967_v30 = vpack.c.bf16 %v963_v27, %v962_v26 }
 0x2e9   : > { %v966_v31 = vpack.c.bf16 %v961_v29, %v960_v28 }
 0x2eb   : > { %1955 = vmatprep.mubr.bf16.mxu1 %v966_v31 }
 0x2ec   : > { %1956 = vmatmul.mubr.bf16.gmra.mrb[12].mxu1 %v967_v30 }
 0x3af   : > { %v1953_v34 = vpop.f32.mrb[8].mxu1 }
 0x3b0   : > { %v1024_v36 = vadd.f32 %v1953_v34, %v1806_v33  ;;  %v1015_v37 = vpop.f32.mrb[9].mxu1 }
 0x3b1   : > { %v1016_v38 = vadd.f32 %v1806_v33, %v1015_v37  ;;  %v1954_v39 = vpop.f32.mrb[10].mxu1 }
 0x3b2   : > { %v1027_v40 = vadd.f32 %v1954_v39, %v1806_v33  ;;  %v1018_v42 = vpop.f32.mrb[11].mxu1  ;;  %v1053_v43 = vsel %vm1046_vm0, %v1024_v36, -inf }
 0x3b3   : > { %v1019_v45 = vadd.f32 %v1806_v33, %v1018_v42  ;;  %1054 = vmax.xlane.f32.xlu1 %v1053_v43  ;;  %v1047_v46 = vsel %vm1046_vm0, %v1016_v38, -inf }
 0x3b4   : > { %1048 = vmax.xlane.f32.xlu0 %v1047_v46  ;;  %v1056_v47 = vsel %vm1046_vm0, %v1027_v40, -inf  ;;  %v2175_v46 = vld [vmem:[#allocation11] sm:$0xff]  }
 0x3b5   : > { %v1050_v48 = vsel %vm1046_vm0, %v1019_v45, -inf  ;;  %1969 = vmatprep.subr.bf16.mxu1 %v2175_v46 }
 0x3b6   : > { %1970 = vmatpush3.bf16.msra.mxu1 %v2175_v46  ;;  %v1813_v46 = vld [vmem:[%s3174_s24] ss:$0 sm:$0xff] }
 0x3b7   : > { %1057 = vmax.xlane.f32.xlu1 %v1056_v47  ;;  %v2176_v47 = vld [vmem:[#allocation11 + $0x8] sm:$0xff]  }
 0x3b8   : > { %1051 = vmax.xlane.f32.xlu0 %v1050_v48  ;;  %1971 = vmatprep.subr.bf16.mxu1 %v2176_v47  ;;  %v2177_v48 = vld [vmem:[#allocation11 + $0x10] sm:$0xff]  }
 0x3ba   : > { %1972 = vmatpush3.bf16.msra.mxu1 %v2176_v47 }
 0x3bb   : > { %1973 = vmatprep.subr.bf16.mxu1 %v2177_v48 }
 0x3be   : > { %1974 = vmatpush3.bf16.msra.mxu1 %v2177_v48 }
 0x3bf   : > { %v1957_v49 = vpop.f32.mrb[12].mxu1 }
 0x3c0   : > { %v1031_v51 = vpop.f32.mrb[13].mxu1  ;;  %v1040_v56 = vadd.f32 %v1957_v49, %v1806_v33  ;;  %v2178_v49 = vld [vmem:[#allocation11 + $0x18] sm:$0xff]  }
 0x3c1   : > { %v1032_v52 = vadd.f32 %v1806_v33, %v1031_v51  ;;  %v1958_v54 = vpop.f32.mrb[14].mxu1  ;;  %1975 = vmatprep.subr.bf16.mxu1 %v2178_v49  ;;  %v2179_v51 = vld [vmem:[#allocation11 + $0x20] sm:$0xff]  }
 0x3c2   : > { %v1034_v55 = vpop.f32.mrb[15].mxu1  ;;  %v1043_v60 = vadd.f32 %v1958_v54, %v1806_v33  ;;  %v1065_v63 = vsel %vm1046_vm0, %v1040_v56, -inf  ;;  %1976 = vmatpush3.bf16.msra.mxu1 %v2178_v49  ;;  %v2181_v54 = vld [vmem:[#allocation11 + $0x30] sm:$0xff]  }
 0x3c3   : > { %v1035_v57 = vadd.f32 %v1806_v33, %v1034_v55  ;;  %v1059_v58 = vsel %vm1046_vm0, %v1032_v52, -inf  ;;  %1977 = vmatprep.subr.bf16.mxu1 %v2179_v51 }
 0x3c4   : > { %1060 = vmax.xlane.f32.xlu0 %v1059_v58  ;;  %v1068_v0 = vsel %vm1046_vm0, %v1043_v60, -inf }
 0x3c5   : > { %v1062_v61 = vsel %vm1046_vm0, %v1035_v57, -inf }
 0x3c6   : > { %1063 = vmax.xlane.f32.xlu1 %v1062_v61  ;;  %1978 = vmatpush3.bf16.msra.mxu1 %v2179_v51 }
 0x3c8   : > { %1066 = vmax.xlane.f32.xlu0 %v1065_v63 }
 0x3ca   : > { %1069 = vmax.xlane.f32.xlu1 %v1068_v0 }
 0x440   : > { %v1055_v2 = vpop.xlane.xlu1 %1054 }
 0x441   : > { %v1073_v3 = vsub.f32 %v1024_v36, %v1055_v2  ;;  %v1049_v4 = vpop.xlane.xlu0 %1048 }
 0x442   : > { %v1071_v5 = vsub.f32 %v1016_v38, %v1049_v4 }
 0x443   : > { %v1083_v6 = vmul.f32 1.442695, %v1073_v3 }
 0x444   : > { %v1079_v7 = vmul.f32 1.442695, %v1071_v5  ;;  %v1058_v8 = vpop.xlane.xlu1 %1057 }
 0x445   : > { %v1074_v9 = vsub.f32 %v1027_v40, %v1058_v8  ;;  %v1052_v10 = vpop.xlane.xlu0 %1051 }
 0x446   : > { %2191 = vpow2.f32 %v1079_v7  ;;  %v1072_v11 = vsub.f32 %v1019_v45, %v1052_v10 }
 0x447   : > { %2193 = vpow2.f32 %v1083_v6  ;;  %v1085_v12 = vmul.f32 1.442695, %v1074_v9 }
 0x448   : > { %v1081_v13 = vmul.f32 1.442695, %v1072_v11 }
 0x44a   : > { %2195 = vpow2.f32 %v1081_v13 }
 0x44b   : > { %2197 = vpow2.f32 %v1085_v12 }
 0x450   : > { %v2973_v14 = vpop.eup %2191 }
 0x451   : > { %v1061_v15 = vpop.xlane.xlu0 %1060  ;;  %v1095_v16 = vsel %vm1046_vm0, %v2973_v14, 0.0  ;;  %v2977_v17 = vpop.eup %2193 }
 0x452   : > { %v1075_v18 = vsub.f32 %v1032_v52, %v1061_v15  ;;  %1096 = vadd.xlane.f32.xlu0 %v1095_v16  ;;  %v1101_v25 = vsel %vm1046_vm0, %v2977_v17, 0.0  ;;  %v2180_v52 = vld [vmem:[#allocation11 + $0x28] sm:$0xff]  }
 0x453   : > { %v1064_v19 = vpop.xlane.xlu1 %1063  ;;  %1979 = vmatprep.subr.bf16.mxu1 %v2180_v52 }
 0x454   : > { %v2979_v20 = vpop.eup %2195  ;;  %v1087_v21 = vmul.f32 1.442695, %v1075_v18  ;;  %v1076_v22 = vsub.f32 %v1035_v57, %v1064_v19  ;;  %1980 = vmatpush3.bf16.msra.mxu1 %v2180_v52 }
 0x455   : > { %v1067_v23 = vpop.xlane.xlu0 %1066  ;;  %v1098_v24 = vsel %vm1046_vm0, %v2979_v20, 0.0  ;;  %v2985_v26 = vpop.eup %2197  ;;  %1981 = vmatprep.subr.bf16.mxu1 %v2181_v54 }
 0x456   : > { %2199 = vpow2.f32 %v1087_v21  ;;  %v1089_v27 = vmul.f32 1.442695, %v1076_v22  ;;  %v1077_v28 = vsub.f32 %v1040_v56, %v1067_v23  ;;  %1099 = vadd.xlane.f32.xlu1 %v1098_v24  ;;  %1102 = vadd.xlane.f32.xlu0 %v1101_v25  ;;  %v1104_v33 = vsel %vm1046_vm0, %v2985_v26, 0.0  ;;  %v2182_v21 = vld [vmem:[#allocation11 + $0x38] sm:$0xff]   ;;  %v2183_v22 = vld [vmem:[#allocation13] sm:$0xff]   ;;  %v2184_v23 = vld [vmem:[#allocation13 + $0x8] sm:$0xff]  }
 0x457   : > { %v1070_v29 = vpop.xlane.xlu1 %1069  ;;  %1993 = vmatprep.subr.bf16.mxu0 %v2183_v22  ;;  %v2185_v24 = vld [vmem:[#allocation13 + $0x10] sm:$0xff]   ;;  %v2186_v25 = vld [vmem:[#allocation13 + $0x18] sm:$0xff]  }
 0x458   : > { %2201 = vpow2.f32 %v1089_v27  ;;  %v1091_v30 = vmul.f32 1.442695, %v1077_v28  ;;  %v1078_v31 = vsub.f32 %v1043_v60, %v1070_v29  ;;  %1982 = vmatpush3.bf16.msra.mxu1 %v2181_v54  ;;  %v2188_v27 = vld [vmem:[#allocation13 + $0x28] sm:$0xff]  }
 0x459   : > { %1983 = vmatprep.subr.bf16.mxu1 %v2182_v21 }
 0x45a   : > { %2203 = vpow2.f32 %v1091_v30  ;;  %v1093_v34 = vmul.f32 1.442695, %v1078_v31  ;;  %1105 = vadd.xlane.f32.xlu1 %v1104_v33 }
 0x45c   : > { %2205 = vpow2.f32 %v1093_v34  ;;  %1984 = vmatpush3.bf16.msra.mxu1 %v2182_v21 }
 0x460   : > { %v2989_v36 = vpop.eup %2199 }
 0x461   : > { %v1107_v37 = vsel %vm1046_vm0, %v2989_v36, 0.0 }
 0x462   : > { %v2202_v38 = vpop.eup %2201  ;;  %1108 = vadd.xlane.f32.xlu0 %v1107_v37 }
 0x463   : > { %v1110_v39 = vsel %vm1046_vm0, %v2202_v38, 0.0 }
 0x464   : > { %v2994_v40 = vpop.eup %2203  ;;  %1111 = vadd.xlane.f32.xlu1 %v1110_v39 }
 0x465   : > { %v1113_v42 = vsel %vm1046_vm0, %v2994_v40, 0.0 }
 0x466   : > { %v2206_v43 = vpop.eup %2205  ;;  %1114 = vadd.xlane.f32.xlu0 %v1113_v42 }
 0x467   : > { %v1116_v45 = vsel %vm1046_vm0, %v2206_v43, 0.0 }
 0x468   : > { %1117 = vadd.xlane.f32.xlu1 %v1116_v45  ;;  %v2190_v45 = vld [vmem:[#allocation13 + $0x38] sm:$0xff]  }
 0x4df   : > { %v1097_v55 = vpop.xlane.xlu0 %1096 }
 0x4e0   : > { %2207 = vrcp.f32 %v1097_v55 }
 0x4e3   : > { %v1100_v56 = vpop.xlane.xlu1 %1099  ;;  %v1103_v57 = vpop.xlane.xlu0 %1102 }
 0x4e4   : > { %2209 = vrcp.f32 %v1100_v56 }
 0x4e5   : > { %2211 = vrcp.f32 %v1103_v57 }
 0x4e7   : > { %v1106_v58 = vpop.xlane.xlu1 %1105 }
 0x4e8   : > { %2213 = vrcp.f32 %v1106_v58 }
 0x4ea   : > { %v2208_v60 = vpop.eup %2207 }
 0x4eb   : > { %v1127_v0 = vmul.f32 %v2208_v60, %v2973_v14 }
 0x4ee   : > { %v2210_v61 = vpop.eup %2209 }
 0x4ef   : > { %v1109_v63 = vpop.xlane.xlu0 %1108  ;;  %v1128_v1 = vmul.f32 %v2210_v61, %v2979_v20  ;;  %v2212_v2 = vpop.eup %2211 }
 0x4f0   : > { %2215 = vrcp.f32 %v1109_v63  ;;  %v1129_v6 = vmul.f32 %v2212_v2, %v2977_v17 }
 0x4f1   : > { %v1112_v3 = vpop.xlane.xlu1 %1111  ;;  %v1135_v4 = vpack.c.bf16 %v1128_v1, %v1127_v0 }
 0x4f2   : > { %v2214_v5 = vpop.eup %2213  ;;  %2217 = vrcp.f32 %v1112_v3 }
 0x4f3   : > { %v1130_v7 = vmul.f32 %v2214_v5, %v2985_v26  ;;  %1961 = vmatprep.mubr.msk.bf16.mxu0 %vm1046_vm0, %v1135_v4  ;;  %v1115_v8 = vpop.xlane.xlu0 %1114  ;;  %v2187_v26 = vld [vmem:[#allocation13 + $0x20] sm:$0xff]  }
 0x4f4   : > { %2219 = vrcp.f32 %v1115_v8 }
 0x4f5   : > { %v1136_v9 = vpack.c.bf16 %v1130_v7, %v1129_v6  ;;  %v1118_v10 = vpop.xlane.xlu1 %1117 }
 0x4f6   : > { %2221 = vrcp.f32 %v1118_v10 }
 0x4f7   : > { %1962 = vmatmul.mubr.msk.bf16.vlgmr.msra.gmra.mrb[16].mxu0 %vm1046_vm0, %v1136_v9 }
 0x4f8   : > { %1994 = vmatpush3.bf16.msra.mxu0 %v2183_v22 }
 0x4f9   : > { %1995 = vmatprep.subr.bf16.mxu0 %v2184_v23 }
 0x4fa   : > { %v2216_v11 = vpop.eup %2215 }
 0x4fb   : > { %v1131_v13 = vmul.f32 %v2216_v11, %v2989_v36 }
 0x4fc   : > { %v2218_v12 = vpop.eup %2217  ;;  %1996 = vmatpush3.bf16.msra.mxu0 %v2184_v23 }
 0x4fd   : > { %v1132_v14 = vmul.f32 %v2218_v12, %v2202_v38  ;;  %1997 = vmatprep.subr.bf16.mxu0 %v2185_v24 }
 0x4fe   : > { %v2220_v15 = vpop.eup %2219 }
 0x4ff   : > { %v1137_v16 = vpack.c.bf16 %v1132_v14, %v1131_v13  ;;  %v1133_v17 = vmul.f32 %v2220_v15, %v2994_v40 }
 0x500   : > { %v2222_v18 = vpop.eup %2221  ;;  %1998 = vmatpush3.bf16.msra.mxu0 %v2185_v24 }
 0x501   : > { %1965 = vmatprep.mubr.msk.bf16.mxu0 %vm1046_vm0, %v1137_v16  ;;  %v1134_v19 = vmul.f32 %v2222_v18, %v2206_v43  ;;  %1999 = vmatprep.subr.bf16.mxu0 %v2186_v25  ;;  %v2189_v43 = vld [vmem:[#allocation13 + $0x30] sm:$0xff]   ;;  %v1830_v16 = vld [vmem:[%s3175_s21] ss:$0 sm:$0xff] }
 0x503   : > { %v1138_v20 = vpack.c.bf16 %v1134_v19, %v1133_v17 }
 0x504   : > { %2000 = vmatpush3.bf16.msra.mxu0 %v2186_v25 }
 0x505   : > { %1966 = vmatmul.mubr.msk.bf16.gmra.mrb[20].mxu0 %vm1046_vm0, %v1138_v20  ;;  %2001 = vmatprep.subr.bf16.mxu0 %v2187_v26 }
 0x508   : > { %2002 = vmatpush3.bf16.msra.mxu0 %v2187_v26 }
 0x509   : > { %2003 = vmatprep.subr.bf16.mxu0 %v2188_v27 }
 0x50c   : > { %2004 = vmatpush3.bf16.msra.mxu0 %v2188_v27 }
 0x50d   : > { %2005 = vmatprep.subr.bf16.mxu0 %v2189_v43 }
 0x510   : > { %2006 = vmatpush3.bf16.msra.mxu0 %v2189_v43 }
 0x511   : > { %2007 = vmatprep.subr.bf16.mxu0 %v2190_v45 }
 0x514   : > { %2008 = vmatpush3.bf16.msra.mxu0 %v2190_v45 }
 0x5ca   : > { %v1963_v28 = vpop.f32.mrb[16].mxu0 }
 0x5cb   : > { %v1191_v29 = vpop.f32.mrb[17].mxu0 }
 0x5cc   : > { %v1964_v30 = vpop.f32.mrb[18].mxu0 }
 0x5cd   : > { %v1223_v31 = vpack.c.bf16 %v1964_v30, %v1963_v28  ;;  %v1194_v33 = vpop.f32.mrb[19].mxu0 }
 0x5ce   : > { %v1222_v34 = vpack.c.bf16 %v1194_v33, %v1191_v29 }
 0x5d0   : > { %1985 = vmatprep.mubr.bf16.mxu1 %v1222_v34 }
 0x5d1   : > { %1986 = vmatmul.mubr.bf16.vlgmr.msra.gmra.mrb[16].mxu1 %v1223_v31 }
 0x5d8   : > { %v1967_v36 = vpop.f32.mrb[20].mxu0 }
 0x5d9   : > { %v1207_v37 = vpop.f32.mrb[21].mxu0 }
 0x5da   : > { %v1968_v38 = vpop.f32.mrb[22].mxu0 }
 0x5db   : > { %v1225_v39 = vpack.c.bf16 %v1968_v38, %v1967_v36  ;;  %v1210_v40 = vpop.f32.mrb[23].mxu0 }
 0x5dc   : > { %v1224_v42 = vpack.c.bf16 %v1210_v40, %v1207_v37 }
 0x5de   : > { %1989 = vmatprep.mubr.bf16.mxu1 %v1224_v42 }
 0x5df   : > { %1990 = vmatmul.mubr.bf16.gmra.mrb[20].mxu1 %v1225_v39 }
 0x6a4   : > { %v1987_v47 = vpop.f32.mrb[16].mxu1 }
 0x6a5   : > { %v1340_v48 = vadd.f32 %v1987_v47, %v1813_v46  ;;  %v1331_v49 = vpop.f32.mrb[17].mxu1 }
 0x6a6   : > { %v1332_v51 = vadd.f32 %v1813_v46, %v1331_v49  ;;  %v1988_v52 = vpop.f32.mrb[18].mxu1 }
 0x6a7   : > { %v1343_v54 = vadd.f32 %v1988_v52, %v1813_v46  ;;  %v1334_v55 = vpop.f32.mrb[19].mxu1  ;;  %v1364_v57 = vmax.f32 %v1340_v48, 0.0 }
 0x6a8   : > { %v1335_v56 = vadd.f32 %v1813_v46, %v1334_v55  ;;  %v1362_v60 = vmax.f32 %v1332_v51, 0.0 }
 0x6a9   : > { %v1365_v58 = vmax.f32 %v1343_v54, 0.0 }
 0x6aa   : > { %v1363_v61 = vmax.f32 %v1335_v56, 0.0 }
 0x6ab   : > { %v1371_v63 = vpack.c.bf16 %v1365_v58, %v1364_v57 }
 0x6ac   : > { %v1370_v0 = vpack.c.bf16 %v1363_v61, %v1362_v60 }
 0x6ae   : > { %2009 = vmatprep.mubr.bf16.mxu0 %v1370_v0 }
 0x6af   : > { %2010 = vmatmul.mubr.bf16.vlgmr.msra.gmra.mrb[24].mxu0 %v1371_v63 }
 0x6b2   : > { %v1991_v1 = vpop.f32.mrb[20].mxu1 }
 0x6b3   : > { %v1356_v2 = vadd.f32 %v1991_v1, %v1813_v46  ;;  %v1347_v3 = vpop.f32.mrb[21].mxu1 }
 0x6b4   : > { %v1348_v4 = vadd.f32 %v1813_v46, %v1347_v3  ;;  %v1992_v5 = vpop.f32.mrb[22].mxu1 }
 0x6b5   : > { %v1359_v6 = vadd.f32 %v1992_v5, %v1813_v46  ;;  %v1350_v7 = vpop.f32.mrb[23].mxu1  ;;  %v1368_v9 = vmax.f32 %v1356_v2, 0.0 }
 0x6b6   : > { %v1351_v8 = vadd.f32 %v1813_v46, %v1350_v7  ;;  %v1366_v11 = vmax.f32 %v1348_v4, 0.0 }
 0x6b7   : > { %v1369_v10 = vmax.f32 %v1359_v6, 0.0 }
 0x6b8   : > { %v1367_v12 = vmax.f32 %v1351_v8, 0.0 }
 0x6b9   : > { %v1373_v13 = vpack.c.bf16 %v1369_v10, %v1368_v9 }
 0x6ba   : > { %v1372_v14 = vpack.c.bf16 %v1367_v12, %v1366_v11 }
 0x6bc   : > { %2013 = vmatprep.mubr.bf16.mxu0 %v1372_v14 }
 0x6bd   : > { %2014 = vmatmul.mubr.bf16.gmra.mrb[28].mxu0 %v1373_v13 }
 0x782   : > { %v2011_v15 = vpop.f32.mrb[24].mxu0 }
 0x783   : > { %v1481_v18 = vadd.f32 %v2011_v15, %v2945_v41  ;;  %v1472_v17 = vpop.f32.mrb[25].mxu0 }
 0x784   : > { %v1473_v19 = vadd.f32 %v1472_v17, %v2941_v32  ;;  %v2012_v20 = vpop.f32.mrb[26].mxu0 }
 0x785   : > { %v1512_v21 = vadd.f32 %v1830_v16, %v1481_v18  ;;  %v1484_v22 = vadd.f32 %v2012_v20, %v2947_v44  ;;  %v1475_v23 = vpop.f32.mrb[27].mxu0 }
 0x786   : > { %v1510_v24 = vadd.f32 %v1830_v16, %v1473_v19  ;;  %v1476_v25 = vadd.f32 %v1475_v23, %v2943_v35 }
 0x787   : > { %v1513_v26 = vadd.f32 %v1830_v16, %v1484_v22  ;;  %v1520_v28 = vmax.f32 %v1512_v21, 0.0 }
 0x788   : > { %v1511_v27 = vadd.f32 %v1830_v16, %v1476_v25  ;;  %v1518_v30 = vmax.f32 %v1510_v24, 0.0 }
 0x789   : > { %v1521_v29 = vmax.f32 %v1513_v26, 0.0 }
 0x78a   : > { %v1519_v31 = vmax.f32 %v1511_v27, 0.0 }
 0x78b   : > { %v1864_v33 = vpack.c.bf16 %v1521_v29, %v1520_v28 }
 0x78c   : > { %v1859_v41 = vpack.c.bf16 %v1519_v31, %v1518_v30 }
 0x78d   : > { %1876 = vst [vmem:[%s584_s19 + $0x8] sm:$0xff] %v1864_v33  }
 0x78e   : > { %1860 = vst [vmem:[%s584_s19] sm:$0xff] %v1859_v41  }
 0x790   : > { %v2015_v32 = vpop.f32.mrb[28].mxu0 }
 0x791   : > { %v1497_v44 = vadd.f32 %v2015_v32, %v2953_v59  ;;  %v1488_v34 = vpop.f32.mrb[29].mxu0 }
 0x792   : > { %v1489_v36 = vadd.f32 %v1488_v34, %v2949_v50  ;;  %v2016_v35 = vpop.f32.mrb[30].mxu0 }
 0x793   : > { %v1516_v37 = vadd.f32 %v1830_v16, %v1497_v44  ;;  %v1500_v38 = vadd.f32 %v2016_v35, %v2955_v62  ;;  %v1491_v39 = vpop.f32.mrb[31].mxu0 }
 0x794   : > { %v1514_v40 = vadd.f32 %v1830_v16, %v1489_v36  ;;  %v1492_v42 = vadd.f32 %v1491_v39, %v2951_v53 }
 0x795   : > { %v1517_v43 = vadd.f32 %v1830_v16, %v1500_v38  ;;  %v1524_v46 = vmax.f32 %v1516_v37, 0.0 }
 0x796   : > { %v1515_v45 = vadd.f32 %v1830_v16, %v1492_v42  ;;  %v1522_v50 = vmax.f32 %v1514_v40, 0.0 }
 0x797   : > { %v1525_v47 = vmax.f32 %v1517_v43, 0.0 }
 0x798   : > { %v1523_v59 = vmax.f32 %v1515_v45, 0.0 }
 0x799   : > { %v1874_v62 = vpack.c.bf16 %v1525_v47, %v1524_v46 }
 0x79a   : > { %v1869_v53 = vpack.c.bf16 %v1523_v59, %v1522_v50 }
 0x79b   : > { %1878 = vst [vmem:[%s584_s19 + $0x18] sm:$0xff] %v1874_v62  }
 0x79c   : > { %1877 = vst [vmem:[%s584_s19 + $0x10] sm:$0xff] %v1869_v53  }
 0x79d   : > { %2438 = shalt.err (!%p2435_p0)
}
 0x79e   : > { %s2439_s29 = scalar_lea.hbm %s3031_s28, 512  ;;  %s2443_s4 = scalar_lea.hbm %s3178_s30, 1024 }
 0x79f   : > { %p2440_p13 = scmp.ne.s32.totalorder %s3031_s28, %s2439_s29  ;;  %p2444_p5 = scmp.lt.u32.totalorder %s3031_s28, %s3178_s30 }
 0x7a0   : > { %p2445_p9 = scmp.lt.u32.totalorder %s2443_s4, %s2439_s29  ;;  %p2447_p4 = scmp.lt.u32.totalorder %s2439_s29, %s3031_s28 }
 0x7a1   : > { %p2441_p8 = pnand %p2440_p13, %p3179_p7 }
 0x7a2   : > { %p2446_p1 = por %p2445_p9, %p2444_p5 }
 0x7a3   : > { %p2442_p12 = pneg %p2441_p8 }
 0x7a4   : > { %p2448_p11 = por %p2447_p4, %p2446_p1 }
 0x7a6   : > { %p2449_p3 = pnand %p2448_p11, %p2442_p12 }
 0x7a8   : > { %2452 = shalt.err (!%p2449_p3)
}
 0x7a9   : > { %s2534_s24 = smov 64   ;;  %s2535_s9 = smov 4  }
 0x7aa   : > { %2039 = dma.vmem_to_hbm [thread:$0]  (%p3179_p7), %s3026_s8, 512, %s3031_s28, %s1567_s26, %s2534_s24, %s2534_s24, %s2535_s9  }
 0x7ab PF: > { %s3180_s15 = sld [smem:[#allocation20_spill]]  ;;  %s3181_s21 = sld [smem:[#allocation26_spill]] }
 0x7ac   : > { %s3182_s19 = sld [smem:[#allocation23_spill]] }
 0x7b1   : > { %s1597_s20 = sand.u32 1, %s3180_s15   ;;  %p3183_p2 = scmp.ne.s32.totalorder %s3181_s21, 0 }
 0x7b2   : > { %p3184_p6 = scmp.ge.s32.totalorder %s3182_s19, 2  ;;  %s1598_s13 = scalar_lea.sflag [#allocation4], %s1597_s20 }
 0x7b4   : > { %p2065_p10 = pnand %p3184_p6, %p3183_p2 }
 0x7b6   : > { %2494 = dma.done.wait (!%p2065_p10), %s1598_s13, 512  }
 0x7b7   : > { %2496 = vsyncadd (!%p2065_p10), %s1598_s13, 4294966784  ;;  %s33_s26 = sadd.s32 1, %s3182_s19   ;;  %s3185_s12 = sld [smem:[#allocation21_spill]] }
 0x7b8   : > { %p30_p0 = scmp.ge.s32.totalorder %s33_s26, 4   ;;  %s3186_s23 = sld [smem:[#allocation29_spill]] }
 0x7b9   : > { %s3187_s11 = sld [smem:[#allocation27_spill]]  ;;  %s3188_s21 = smov %s2503_s22 }
 0x7ba   : > { %s3190_s24 = smov %s2515_s25  ;;  %32 = sbr.rel (!%p30_p0) target bundleno = 20 (0x14), region = 153 }
 0x7bd   : > { %s3189_s22 = smov %s3185_s12 }
 0x7bf   : > { %s3191_s25 = smov %s3187_s11 }
 0x7c1   :  { %1603 = vsyncpa [#allocation3], 1 }
 0x7c2   :  { %1605 = vsyncpa [#allocation3 + $0x1], 1 }
 0x7c3   :  { %1606 = vsyncpa [#allocation6], 1 }
 0x7c4   :  { %1608 = vsyncpa [#allocation6 + $0x1], 1 }
 0x7c5   :  { %1609 = vsyncpa [#allocation9], 1 }
 0x7c6   :  { %1610 = vsyncpa [#allocation12], 1 }
 0x7c7   :  { %1611 = vsyncpa [#allocation4], 1 }
 0x7c8   :  { %1613 = vsyncpa [#allocation4 + $0x1], 1 }

</bundles_post_ra>
